<compile_context>
chip_gen: v5e
topology: v5e:2x2
jax: 0.10.0
libtpu: 0.0.40
codegen_flags: <defaults>
</compile_context>

<pallas_src>
import jax
import jax.numpy as jnp
from jax.experimental import pallas as pl
from jax.experimental.pallas import tpu as pltpu

LATENT_DIM = 64
HIDDEN = 512
OUT = 28 * 28           # 784 — stored directly (6 lane-dense vregs + 1 masked)
DEFAULT_TILE_B = 512    # amortizes ~0.35 us/step grid overhead; ~8 MiB resident


def _round_up(x, m):
    return ((x + m - 1) // m) * m


def _cdiv(a, b):
    return (a + b - 1) // b


def _bf16_eup_supported():
    """bf16 transcendentals pay off on v6e / v7x; keep f32 tanh elsewhere."""
    try:
        kind = jax.devices()[0].device_kind.lower()
    except Exception:
        return False
    return ("v6" in kind) or ("v7" in kind)


def _choose_tile_b(b8, tile_b):
    """Pick the batch tile. b8 is the batch rounded up to a multiple of 8."""
    tile_b = max(8, _round_up(tile_b, 8))
    if b8 <= 8:
        return b8
    if b8 <= tile_b:
        # Split into >= 2 grid steps so v7x can shard the "parallel" batch axis
        # across its 2 TensorCores (neutral on single-TC v5e/v6e).
        return _round_up(_cdiv(b8, 2), 8)
    return tile_b


def _make_decoder_kernel(bf16_tanh):
    def kernel(z_ref, w1_ref, b1_ref, w2_ref, b2_ref, out_ref):
        # z:  (TB, 64)  f32 -> bf16 for the MXU
        # w1: (64, 512) bf16, b1: (1, 512) f32
        # w2: (512, 784) bf16, b2: (1, 784) f32
        # out: (TB, 784) f32
        z = z_ref[...].astype(jnp.bfloat16)
        h = jnp.dot(z, w1_ref[...], preferred_element_type=jnp.float32) + b1_ref[...]
        h = jnp.maximum(h, 0.0)                                    # ReLU
        y = jnp.dot(h.astype(jnp.bfloat16), w2_ref[...],
                    preferred_element_type=jnp.float32) + b2_ref[...]
        if bf16_tanh:
            out_ref[...] = jnp.tanh(y.astype(jnp.bfloat16)).astype(jnp.float32)
        else:
            out_ref[...] = jnp.tanh(y)                             # Tanh
    return kernel


def decoder_forward(z, w1, b1, w2, b2, *, tile_b=DEFAULT_TILE_B, bf16_tanh=None):
    """z: (B, 64) f32; w1 (64,512) bf16; b1 (1,512) f32; w2 (512,784) bf16;
    b2 (1,784) f32  ->  (B, 1, 28, 28) f32."""
    if bf16_tanh is None:
        bf16_tanh = _bf16_eup_supported()

    B = z.shape[0]
    # Pad batch only to a multiple of 8 (sublane); partial last grid blocks are
    # handled by Pallas boundary masking, so no near-full-tile overshoot.
    B8 = _round_up(max(B, 1), 8)
    if B8 != B:
        z = jnp.pad(z, ((0, B8 - B), (0, 0)))

    TB = _choose_tile_b(B8, tile_b)
    grid = (pl.cdiv(B8, TB),)

    cost = pl.CostEstimate(
        flops=2 * B8 * (LATENT_DIM * HIDDEN + HIDDEN * OUT),
        transcendentals=B8 * OUT,
        bytes_accessed=(z.size * z.dtype.itemsize
                        + w1.size * w1.dtype.itemsize + b1.size * b1.dtype.itemsize
                        + w2.size * w2.dtype.itemsize + b2.size * b2.dtype.itemsize
                        + B8 * OUT * 4),
    )

    out_flat = pl.pallas_call(
        _make_decoder_kernel(bf16_tanh),
        out_shape=jax.ShapeDtypeStruct((B8, OUT), jnp.float32),
        grid=grid,
        in_specs=[
            pl.BlockSpec((TB, LATENT_DIM), lambda i: (i, 0)),
            # Weights / biases: constant index_map -> VMEM-resident, no re-DMA.
            pl.BlockSpec((LATENT_DIM, HIDDEN), lambda i: (0, 0)),
            pl.BlockSpec((1, HIDDEN), lambda i: (0, 0)),
            pl.BlockSpec((HIDDEN, OUT), lambda i: (0, 0)),
            pl.BlockSpec((1, OUT), lambda i: (0, 0)),
        ],
        out_specs=pl.BlockSpec((TB, OUT), lambda i: (i, 0)),
        compiler_params=pltpu.CompilerParams(
            dimension_semantics=("parallel",),
            vmem_limit_bytes=32 * 1024 * 1024,
        ),
        cost_estimate=cost,
    )(z, w1, b1, w2, b2)

    out = out_flat if B8 == B else out_flat[:B]
    # PyTorch-style view(-1, 1, 28, 28).
    return out.reshape(B, 1, 28, 28)


def init_params(key):
    """Deterministic init mimicking nn.Linear's uniform(-1/sqrt(fan_in), ...).
    Weights stored as (in, out) in bf16 (streamed dtype); biases in f32."""
    k1, k2, k3, k4 = jax.random.split(key, 4)
    bound1 = 1.0 / jnp.sqrt(LATENT_DIM)
    bound2 = 1.0 / jnp.sqrt(HIDDEN)
    w1 = jax.random.uniform(k1, (LATENT_DIM, HIDDEN), jnp.float32, -bound1, bound1)
    b1 = jax.random.uniform(k2, (1, HIDDEN), jnp.float32, -bound1, bound1)
    w2 = jax.random.uniform(k3, (HIDDEN, OUT), jnp.float32, -bound2, bound2)
    b2 = jax.random.uniform(k4, (1, OUT), jnp.float32, -bound2, bound2)
    return w1.astype(jnp.bfloat16), b1, w2.astype(jnp.bfloat16), b2


if __name__ == "__main__":
    key = jax.random.PRNGKey(0)
    k_params, k_z = jax.random.split(key)

    w1, b1, w2, b2 = init_params(k_params)

    B = 8
    z = jax.random.normal(k_z, (B, LATENT_DIM), jnp.float32)

    x_recon = decoder_forward(z, w1, b1, w2, b2)
    x_recon = jax.block_until_ready(x_recon)

    # Plain-JAX reference of the same (bf16-weight, f32-accumulate) math.
    h_ref = jnp.dot(z.astype(jnp.bfloat16), w1,
                    preferred_element_type=jnp.float32) + b1
    h_ref = jnp.maximum(h_ref, 0.0)
    y_ref = jnp.dot(h_ref.astype(jnp.bfloat16), w2,
                    preferred_element_type=jnp.float32) + b2
    ref = jnp.tanh(y_ref).reshape(B, 1, 28, 28)

    assert x_recon.shape == (B, 1, 28, 28)
    assert jnp.allclose(x_recon, ref, atol=2e-2, rtol=2e-2)

    print("KERNEL_OK")
</pallas_src>

<mosaic_0001>
module attributes {stable_mosaic.version = 11 : i64} {
  func.func @kernel(%arg0: i32, %arg1: memref<8x64xf32, #tpu.memory_space<vmem>>, %arg2: memref<64x512xbf16, #tpu.memory_space<vmem>>, %arg3: memref<1x512xf32, #tpu.memory_space<vmem>>, %arg4: memref<512x784xbf16, #tpu.memory_space<vmem>>, %arg5: memref<1x784xf32, #tpu.memory_space<vmem>>, %arg6: memref<8x784xf32, #tpu.memory_space<vmem>>) attributes {dimension_semantics = [#tpu.dimension_semantics<parallel>], iteration_bounds = array<i64: 1>, scalar_prefetch = 0 : i64, scratch_operands = 0 : i64, tpu.core_type = #tpu.core_type<tc>, window_params = [{transform_indices = @transform_0, window_bounds = array<i64: 8, 64>}, {pipeline_mode = #tpu.pipeline_mode<synchronous>, transform_indices = @transform_1, window_bounds = array<i64: 64, 512>}, {pipeline_mode = #tpu.pipeline_mode<synchronous>, transform_indices = @transform_2, window_bounds = array<i64: 1, 512>}, {pipeline_mode = #tpu.pipeline_mode<synchronous>, transform_indices = @transform_3, window_bounds = array<i64: 512, 784>}, {pipeline_mode = #tpu.pipeline_mode<synchronous>, transform_indices = @transform_4, window_bounds = array<i64: 1, 784>}, {transform_indices = @transform_5, window_bounds = array<i64: 8, 784>}]} {
    %c0 = arith.constant 0 : index
    %c0_0 = arith.constant 0 : index
    %0 = vector.load %arg1[%c0, %c0_0] : memref<8x64xf32, #tpu.memory_space<vmem>>, vector<8x64xf32>
    %1 = arith.truncf %0 : vector<8x64xf32> to vector<8x64xbf16>
    %c0_1 = arith.constant 0 : index
    %c0_2 = arith.constant 0 : index
    %2 = vector.load %arg2[%c0_1, %c0_2] : memref<64x512xbf16, #tpu.memory_space<vmem>>, vector<64x512xbf16>
    %cst = arith.constant dense<0.000000e+00> : vector<8x512xf32>
    %3 = tpu.matmul %1, %2, %cst {dimension_numbers = #tpu.dot_dimension_numbers<[1], [0], [0], [1], [0, 0, 1, 1], [], []>} : vector<8x64xbf16>, vector<64x512xbf16>, vector<8x512xf32> -> vector<8x512xf32>
    %c0_3 = arith.constant 0 : index
    %c0_4 = arith.constant 0 : index
    %4 = vector.load %arg3[%c0_3, %c0_4] : memref<1x512xf32, #tpu.memory_space<vmem>>, vector<1x512xf32>
    %5 = vector.broadcast %4 : vector<1x512xf32> to vector<8x512xf32>
    %6 = arith.addf %3, %5 : vector<8x512xf32>
    %cst_5 = arith.constant 0.000000e+00 : f32
    %7 = vector.broadcast %cst_5 : f32 to vector<8x512xf32>
    %8 = arith.maximumf %6, %7 : vector<8x512xf32>
    %9 = arith.truncf %8 : vector<8x512xf32> to vector<8x512xbf16>
    %c0_6 = arith.constant 0 : index
    %c0_7 = arith.constant 0 : index
    %10 = vector.load %arg4[%c0_6, %c0_7] : memref<512x784xbf16, #tpu.memory_space<vmem>>, vector<512x784xbf16>
    %cst_8 = arith.constant dense<0.000000e+00> : vector<8x784xf32>
    %11 = tpu.matmul %9, %10, %cst_8 {dimension_numbers = #tpu.dot_dimension_numbers<[1], [0], [0], [1], [0, 0, 1, 1], [], []>} : vector<8x512xbf16>, vector<512x784xbf16>, vector<8x784xf32> -> vector<8x784xf32>
    %c0_9 = arith.constant 0 : index
    %c0_10 = arith.constant 0 : index
    %12 = vector.load %arg5[%c0_9, %c0_10] : memref<1x784xf32, #tpu.memory_space<vmem>>, vector<1x784xf32>
    %13 = vector.broadcast %12 : vector<1x784xf32> to vector<8x784xf32>
    %14 = arith.addf %11, %13 : vector<8x784xf32>
    %15 = math.tanh %14 : vector<8x784xf32>
    %c0_11 = arith.constant 0 : index
    %c0_12 = arith.constant 0 : index
    %16 = vector.load %arg6[%c0_11, %c0_12] : memref<8x784xf32, #tpu.memory_space<vmem>>, vector<8x784xf32>
    tpu.vector_store %arg6[%c0_11, %c0_12], %15 {strides = array<i32>} : memref<8x784xf32, #tpu.memory_space<vmem>>, vector<8x784xf32>,
    return
  }
  func.func @transform_0(%arg0: i32) -> (i32, i32) {
    %c0_i32 = arith.constant 0 : i32
    %c0_i32_0 = arith.constant 0 : i32
    return %arg0, %c0_i32 : i32, i32
  }
  func.func @transform_1(%arg0: i32) -> (i32, i32) {
    %c0_i32 = arith.constant 0 : i32
    %c0_i32_0 = arith.constant 0 : i32
    %c0_i32_1 = arith.constant 0 : i32
    return %c0_i32, %c0_i32_0 : i32, i32
  }
  func.func @transform_2(%arg0: i32) -> (i32, i32) {
    %c0_i32 = arith.constant 0 : i32
    %c0_i32_0 = arith.constant 0 : i32
    %c0_i32_1 = arith.constant 0 : i32
    return %c0_i32, %c0_i32_0 : i32, i32
  }
  func.func @transform_3(%arg0: i32) -> (i32, i32) {
    %c0_i32 = arith.constant 0 : i32
    %c0_i32_0 = arith.constant 0 : i32
    %c0_i32_1 = arith.constant 0 : i32
    return %c0_i32, %c0_i32_0 : i32, i32
  }
  func.func @transform_4(%arg0: i32) -> (i32, i32) {
    %c0_i32 = arith.constant 0 : i32
    %c0_i32_0 = arith.constant 0 : i32
    %c0_i32_1 = arith.constant 0 : i32
    return %c0_i32, %c0_i32_0 : i32, i32
  }
  func.func @transform_5(%arg0: i32) -> (i32, i32) {
    %c0_i32 = arith.constant 0 : i32
    %c0_i32_0 = arith.constant 0 : i32
    return %arg0, %c0_i32 : i32, i32
  }
}

</mosaic_0001>

<bundles_post_ra>
// kernel: tpu_custom_call.1
= control target key start
LH: loop header
LB: loop body
LE: loop exit
PB: predicated region body
PF: predicated region fallthrough
CT: control target
= control target key end

     0   :  { %vm130_vm0 = vcmask 523264   ;;  %s4790_s0 = inlined_call_operand.vmem [shape: f32[8,64], index: 0, kind: input, shape index: {}]   ;;  %s4791_s1 = inlined_call_operand.vmem [shape: bf16[64,512], index: 1, kind: input, shape index: {}]   ;;  %s4792_s2 = inlined_call_operand.vmem [shape: f32[1,512], index: 2, kind: input, shape index: {}]   ;;  %s4793_s3 = inlined_call_operand.vmem [shape: bf16[512,784], index: 3, kind: input, shape index: {}]   ;;  %s4794_s4 = inlined_call_operand.vmem [shape: f32[1,784], index: 4, kind: input, shape index: {}]   ;;  %s4795_s5 = inlined_call_operand.hbm [shape: f32[8,784], index: 5, kind: output, shape index: {}]  }
   0x1   :  { %v2063_v0 = vld [vmem:[%s4791_s1 + $0x60] sm:$0xf]  ;;  %v2991_v1 = vld [vmem:[%s4791_s1 + $0x6c] sm:$0xf0]  ;;  %v2989_v2 = vld [vmem:[%s4791_s1 + $0x64] sm:$0xf] }
   0x2   :  { %v2064_v3 = vor.u32 %v2991_v1, %v2063_v0  ;;  %v2065_v4 = vld [vmem:[%s4791_s1 + $0x70] sm:$0xf0]  ;;  %v2071_v5 = vld [vmem:[%s4791_s1 + $0x68] sm:$0xf]  ;;  %v2992_v6 = vld [vmem:[%s4791_s1 + $0x74] sm:$0xf0] }
   0x3   :  { %v2068_v7 = vor.u32 %v2989_v2, %v2065_v4  ;;  %v2072_v8 = vor.u32 %v2992_v6, %v2071_v5  ;;  %v2990_v9 = vld [vmem:[%s4791_s1 + $0x6c] sm:$0xf]  ;;  %v2073_v10 = vld [vmem:[%s4791_s1 + $0x78] sm:$0xf0]  ;;  %v2047_v11 = vld [vmem:[%s4791_s1 + $0x40] sm:$0xf] }
   0x4   :  { %138 = vmatpush.bf16.msra.mxu0 %v2064_v3  ;;  %v2076_v12 = vor.u32 %v2990_v9, %v2073_v10  ;;  %v2987_v13 = vld [vmem:[%s4791_s1 + $0x4c] sm:$0xf0]  ;;  %v2985_v14 = vld [vmem:[%s4791_s1 + $0x44] sm:$0xf]  ;;  %v2049_v15 = vld [vmem:[%s4791_s1 + $0x50] sm:$0xf0] }
   0x5   :  { %151 = vmatpush.bf16.msra.mxu1 %v2068_v7  ;;  %164 = vmatpush.bf16.msra.mxu2 %v2072_v8  ;;  %v2048_v16 = vor.u32 %v2987_v13, %v2047_v11  ;;  %v2052_v17 = vor.u32 %v2985_v14, %v2049_v15  ;;  %v2055_v18 = vld [vmem:[%s4791_s1 + $0x48] sm:$0xf]  ;;  %v2988_v19 = vld [vmem:[%s4791_s1 + $0x54] sm:$0xf0]  ;;  %v2986_v20 = vld [vmem:[%s4791_s1 + $0x4c] sm:$0xf] }
   0x6   :  { %177 = vmatpush.bf16.msra.mxu3 %v2076_v12  ;;  %v2056_v21 = vor.u32 %v2988_v19, %v2055_v18  ;;  %v2057_v22 = vld [vmem:[%s4791_s1 + $0x58] sm:$0xf0]  ;;  %v2031_v23 = vld [vmem:[%s4791_s1 + $0x20] sm:$0xf]  ;;  %v2983_v24 = vld [vmem:[%s4791_s1 + $0x2c] sm:$0xf0] }
   0x7   :  { %v2060_v25 = vor.u32 %v2986_v20, %v2057_v22  ;;  %v2981_v26 = vld [vmem:[%s4791_s1 + $0x24] sm:$0xf]  ;;  %v2033_v27 = vld [vmem:[%s4791_s1 + $0x30] sm:$0xf0]  ;;  %v2039_v28 = vld [vmem:[%s4791_s1 + $0x28] sm:$0xf]  ;;  %v2032_v29 = vor.u32 %v2983_v24, %v2031_v23 }
   0x8   :  { %139 = vmatpush.bf16.msra.mxu0 %v2048_v16  ;;  %v2984_v30 = vld [vmem:[%s4791_s1 + $0x34] sm:$0xf0]  ;;  %v2982_v31 = vld [vmem:[%s4791_s1 + $0x2c] sm:$0xf]  ;;  %v2041_v32 = vld [vmem:[%s4791_s1 + $0x38] sm:$0xf0]  ;;  %v2036_v33 = vor.u32 %v2981_v26, %v2033_v27 }
   0x9   :  { %152 = vmatpush.bf16.msra.mxu1 %v2052_v17  ;;  %165 = vmatpush.bf16.msra.mxu2 %v2056_v21  ;;  %v2040_v34 = vor.u32 %v2984_v30, %v2039_v28  ;;  %v2015_v35 = vld [vmem:[%s4791_s1] sm:$0xf]  ;;  %v2979_v36 = vld [vmem:[%s4791_s1 + $0xc] sm:$0xf0]  ;;  %v2977_v37 = vld [vmem:[%s4791_s1 + $0x4] sm:$0xf]  ;;  %v2044_v38 = vor.u32 %v2982_v31, %v2041_v32 }
   0xa   :  { %178 = vmatpush.bf16.msra.mxu3 %v2060_v25  ;;  %v2017_v39 = vld [vmem:[%s4791_s1 + $0x10] sm:$0xf0]  ;;  %v2023_v40 = vld [vmem:[%s4791_s1 + $0x8] sm:$0xf]  ;;  %v2980_v41 = vld [vmem:[%s4791_s1 + $0x14] sm:$0xf0]  ;;  %v2016_v45 = vor.u32 %v2979_v36, %v2015_v35 }
   0xb   :  { %v2978_v42 = vld [vmem:[%s4791_s1 + $0xc] sm:$0xf]  ;;  %v2025_v43 = vld [vmem:[%s4791_s1 + $0x18] sm:$0xf0]  ;;  %v22_v44 = vld [vmem:[%s4790_s0] sm:$0xff]  ;;  %v2020_v49 = vor.u32 %v2977_v37, %v2017_v39  ;;  %v2024_v50 = vor.u32 %v2980_v41, %v2023_v40 }
   0xc   :  { %140 = vmatpush.bf16.msra.mxu0 %v2032_v29  ;;  %v2279_v46 = vld [vmem:[%s4793_s3 + $0x188] sm:$0xf]  ;;  %v3045_v47 = vld [vmem:[%s4793_s3 + $0x1a0] sm:$0xf0]  ;;  %v2028_v52 = vor.u32 %v2978_v42, %v2025_v43  ;;  %v2251_v54 = vld [vmem:[%s4793_s3 + $0x150] sm:$0xf]  ;;  %v23_v57 = vpack.c.bf16 %v22_v44, %v22_v44 }
   0xd   :  { %v2503_v48 = vld [vmem:[%s4793_s3 + $0x348] sm:$0xf]  ;;  %153 = vmatpush.bf16.msra.mxu1 %v2036_v33  ;;  %166 = vmatpush.bf16.msra.mxu2 %v2040_v34  ;;  %v3101_v51 = vld [vmem:[%s4793_s3 + $0x360] sm:$0xf0]  ;;  %v2280_v53 = vor.u32 %v3045_v47, %v2279_v46  ;;  %v3038_v55 = vld [vmem:[%s4793_s3 + $0x168] sm:$0xf0] }
   0xe   :  { %179 = vmatpush.bf16.msra.mxu3 %v2044_v38  ;;  %v2727_v56 = vld [vmem:[%s4793_s3 + $0x508] sm:$0xf]  ;;  %v2504_v58 = vor.u32 %v3101_v51, %v2503_v48  ;;  %v3157_v59 = vld [vmem:[%s4793_s3 + $0x520] sm:$0xf0]  ;;  %v2475_v62 = vld [vmem:[%s4793_s3 + $0x310] sm:$0xf]  ;;  %v2252_v1 = vor.u32 %v3038_v55, %v2251_v54 }
   0xf   :  { %v2951_v60 = vld [vmem:[%s4793_s3 + $0x6c8] sm:$0xf]  ;;  %v3213_v61 = vld [vmem:[%s4793_s3 + $0x6e0] sm:$0xf0]  ;;  %v3094_v63 = vld [vmem:[%s4793_s3 + $0x328] sm:$0xf0]  ;;  %v2728_v0 = vor.u32 %v3157_v59, %v2727_v56 }
  0x10   :  { %141 = vmatpush.bf16.msra.mxu0 %v2016_v45  ;;  %v2952_v2 = vor.u32 %v3213_v61, %v2951_v60  ;;  %v2223_v3 = vld [vmem:[%s4793_s3 + $0x118] sm:$0xf]  ;;  %v2699_v4 = vld [vmem:[%s4793_s3 + $0x4d0] sm:$0xf]  ;;  %v3150_v5 = vld [vmem:[%s4793_s3 + $0x4e8] sm:$0xf0]  ;;  %v2476_v6 = vor.u32 %v3094_v63, %v2475_v62 }
  0x11   :  { %154 = vmatpush.bf16.msra.mxu1 %v2020_v49  ;;  %167 = vmatpush.bf16.msra.mxu2 %v2024_v50  ;;  %v3031_v7 = vld [vmem:[%s4793_s3 + $0x130] sm:$0xf0]  ;;  %v2923_v8 = vld [vmem:[%s4793_s3 + $0x690] sm:$0xf]  ;;  %v3206_v9 = vld [vmem:[%s4793_s3 + $0x6a8] sm:$0xf0]  ;;  %v2700_v12 = vor.u32 %v3150_v5, %v2699_v4 }
  0x12   :  { %180 = vmatpush.bf16.msra.mxu3 %v2028_v52  ;;  %v2447_v10 = vld [vmem:[%s4793_s3 + $0x2d8] sm:$0xf]  ;;  %v3087_v11 = vld [vmem:[%s4793_s3 + $0x2f0] sm:$0xf0]  ;;  %v2224_v13 = vor.u32 %v3031_v7, %v2223_v3  ;;  %v2924_v14 = vor.u32 %v3206_v9, %v2923_v8  ;;  %v2195_v15 = vld [vmem:[%s4793_s3 + $0xe0] sm:$0xf] }
  0x13   :  { %2077 = vmatmul.msk.bf16.vlgmr.msra.gmra.mxu0 %vm130_vm0, %v23_v57  ;;  %v2671_v16 = vld [vmem:[%s4793_s3 + $0x498] sm:$0xf]  ;;  %v3143_v17 = vld [vmem:[%s4793_s3 + $0x4b0] sm:$0xf0]  ;;  %v2448_v18 = vor.u32 %v3087_v11, %v2447_v10  ;;  %v3024_v19 = vld [vmem:[%s4793_s3 + $0xf8] sm:$0xf0] }
  0x14   :  { %1618 = vmatpush.bf16.msrb.mxu0 %v2280_v53  ;;  %2078 = vmatmul.msk.bf16.vlgmr.msra.gmra.mxu1 %vm130_vm0, %v23_v57  ;;  %v2895_v20 = vld [vmem:[%s4793_s3 + $0x658] sm:$0xf]  ;;  %v3199_v21 = vld [vmem:[%s4793_s3 + $0x670] sm:$0xf0]  ;;  %v2419_v22 = vld [vmem:[%s4793_s3 + $0x2a0] sm:$0xf]  ;;  %v2672_v24 = vor.u32 %v3143_v17, %v2671_v16  ;;  %v2196_v25 = vor.u32 %v3024_v19, %v2195_v15 }
  0x15   :  { %1631 = vmatpush.bf16.msrb.mxu1 %v2504_v58  ;;  %2079 = vmatmul.msk.bf16.vlgmr.msra.gmra.mxu2 %vm130_vm0, %v23_v57  ;;  %v3080_v23 = vld [vmem:[%s4793_s3 + $0x2b8] sm:$0xf0]  ;;  %v2896_v26 = vor.u32 %v3199_v21, %v2895_v20  ;;  %v2167_v27 = vld [vmem:[%s4793_s3 + $0xa8] sm:$0xf]  ;;  %v2643_v28 = vld [vmem:[%s4793_s3 + $0x460] sm:$0xf] }
  0x16   :  { %2080 = vmatmul.msk.bf16.vlgmr.msra.gmra.mxu3 %vm130_vm0, %v23_v57  ;;  %1644 = vmatpush.bf16.msrb.mxu2 %v2728_v0  ;;  %v3136_v29 = vld [vmem:[%s4793_s3 + $0x478] sm:$0xf0]  ;;  %v2420_v30 = vor.u32 %v3080_v23, %v2419_v22  ;;  %v3017_v31 = vld [vmem:[%s4793_s3 + $0xc0] sm:$0xf0]  ;;  %v2867_v32 = vld [vmem:[%s4793_s3 + $0x620] sm:$0xf] }
  0x17   :  { %1657 = vmatpush.bf16.msrb.mxu3 %v2952_v2  ;;  %v3192_v33 = vld [vmem:[%s4793_s3 + $0x638] sm:$0xf0]  ;;  %v2391_v34 = vld [vmem:[%s4793_s3 + $0x268] sm:$0xf]  ;;  %v3073_v35 = vld [vmem:[%s4793_s3 + $0x280] sm:$0xf0]  ;;  %v2644_v36 = vor.u32 %v3136_v29, %v2643_v28  ;;  %v2168_v37 = vor.u32 %v3017_v31, %v2167_v27 }
  0x18   :  { %1619 = vmatpush.bf16.msrb.mxu0 %v2252_v1  ;;  %v2868_v38 = vor.u32 %v3192_v33, %v2867_v32  ;;  %v2139_v39 = vld [vmem:[%s4793_s3 + $0x70] sm:$0xf]  ;;  %v2615_v40 = vld [vmem:[%s4793_s3 + $0x428] sm:$0xf]  ;;  %v3129_v41 = vld [vmem:[%s4793_s3 + $0x440] sm:$0xf0]  ;;  %v2392_v42 = vor.u32 %v3073_v35, %v2391_v34 }
  0x19   :  { %1632 = vmatpush.bf16.msrb.mxu1 %v2476_v6  ;;  %v3010_v43 = vld [vmem:[%s4793_s3 + $0x88] sm:$0xf0]  ;;  %v2839_v44 = vld [vmem:[%s4793_s3 + $0x5e8] sm:$0xf]  ;;  %v3185_v45 = vld [vmem:[%s4793_s3 + $0x600] sm:$0xf0]  ;;  %v2616_v48 = vor.u32 %v3129_v41, %v2615_v40 }
  0x1a   :  { %1645 = vmatpush.bf16.msrb.mxu2 %v2700_v12  ;;  %v2363_v46 = vld [vmem:[%s4793_s3 + $0x230] sm:$0xf]  ;;  %v3066_v47 = vld [vmem:[%s4793_s3 + $0x248] sm:$0xf0]  ;;  %v2140_v49 = vor.u32 %v3010_v43, %v2139_v39  ;;  %v2840_v50 = vor.u32 %v3185_v45, %v2839_v44  ;;  %v2111_v51 = vld [vmem:[%s4793_s3 + $0x38] sm:$0xf] }
  0x1b   :  { %1658 = vmatpush.bf16.msrb.mxu3 %v2924_v14  ;;  %v2587_v52 = vld [vmem:[%s4793_s3 + $0x3f0] sm:$0xf]  ;;  %v3122_v53 = vld [vmem:[%s4793_s3 + $0x408] sm:$0xf0]  ;;  %v2364_v54 = vor.u32 %v3066_v47, %v2363_v46  ;;  %v3003_v55 = vld [vmem:[%s4793_s3 + $0x50] sm:$0xf0] }
  0x1c   :  { %1620 = vmatpush.bf16.msrb.mxu0 %v2224_v13  ;;  %v2811_v56 = vld [vmem:[%s4793_s3 + $0x5b0] sm:$0xf]  ;;  %v3178_v57 = vld [vmem:[%s4793_s3 + $0x5c8] sm:$0xf0]  ;;  %v2335_v58 = vld [vmem:[%s4793_s3 + $0x1f8] sm:$0xf]  ;;  %v2588_v60 = vor.u32 %v3122_v53, %v2587_v52  ;;  %v2112_v62 = vor.u32 %v3003_v55, %v2111_v51 }
  0x1d   :  { %1633 = vmatpush.bf16.msrb.mxu1 %v2448_v18  ;;  %v3059_v59 = vld [vmem:[%s4793_s3 + $0x210] sm:$0xf0]  ;;  %v2083_v61 = vld [vmem:[%s4793_s3] sm:$0xf]  ;;  %v2812_v63 = vor.u32 %v3178_v57, %v2811_v56  ;;  %v2996_v0 = vld [vmem:[%s4793_s3 + $0x18] sm:$0xf0] }
  0x1e   :  { %1646 = vmatpush.bf16.msrb.mxu2 %v2672_v24  ;;  %v2559_v1 = vld [vmem:[%s4793_s3 + $0x3b8] sm:$0xf]  ;;  %v3115_v2 = vld [vmem:[%s4793_s3 + $0x3d0] sm:$0xf0]  ;;  %v2336_v3 = vor.u32 %v3059_v59, %v2335_v58  ;;  %v2307_v4 = vld [vmem:[%s4793_s3 + $0x1c0] sm:$0xf]  ;;  %v2084_v13 = vor.u32 %v2996_v0, %v2083_v61 }
  0x1f   :  { %1659 = vmatpush.bf16.msrb.mxu3 %v2896_v26  ;;  %v2783_v5 = vld [vmem:[%s4793_s3 + $0x578] sm:$0xf]  ;;  %v3171_v6 = vld [vmem:[%s4793_s3 + $0x590] sm:$0xf0]  ;;  %v3052_v7 = vld [vmem:[%s4793_s3 + $0x1d8] sm:$0xf0]  ;;  %v2560_v12 = vor.u32 %v3115_v2, %v2559_v1 }
  0x20   :  { %1621 = vmatpush.bf16.msrb.mxu0 %v2196_v25  ;;  %v3042_v8 = vld [vmem:[%s4793_s3 + $0x18c] sm:$0xf]  ;;  %v2281_v9 = vld [vmem:[%s4793_s3 + $0x1a4] sm:$0xf0]  ;;  %v2784_v14 = vor.u32 %v3171_v6, %v2783_v5  ;;  %v3035_v15 = vld [vmem:[%s4793_s3 + $0x154] sm:$0xf]  ;;  %v2308_v19 = vor.u32 %v3052_v7, %v2307_v4 }
  0x21   :  { %1634 = vmatpush.bf16.msrb.mxu1 %v2420_v30  ;;  %v3098_v10 = vld [vmem:[%s4793_s3 + $0x34c] sm:$0xf]  ;;  %v2505_v11 = vld [vmem:[%s4793_s3 + $0x364] sm:$0xf0]  ;;  %v2531_v16 = vld [vmem:[%s4793_s3 + $0x380] sm:$0xf]  ;;  %v2284_v20 = vor.u32 %v3042_v8, %v2281_v9 }
  0x22   :  { %1647 = vmatpush.bf16.msrb.mxu2 %v2644_v36  ;;  %v3108_v17 = vld [vmem:[%s4793_s3 + $0x398] sm:$0xf0]  ;;  %v2755_v18 = vld [vmem:[%s4793_s3 + $0x540] sm:$0xf]  ;;  %v3154_v22 = vld [vmem:[%s4793_s3 + $0x50c] sm:$0xf]  ;;  %v2508_v24 = vor.u32 %v3098_v10, %v2505_v11 }
  0x23   :  { %1660 = vmatpush.bf16.msrb.mxu3 %v2868_v38  ;;  %v3164_v21 = vld [vmem:[%s4793_s3 + $0x558] sm:$0xf0]  ;;  %v2729_v23 = vld [vmem:[%s4793_s3 + $0x524] sm:$0xf0]  ;;  %v2253_v25 = vld [vmem:[%s4793_s3 + $0x16c] sm:$0xf0]  ;;  %v2532_v30 = vor.u32 %v3108_v17, %v2531_v16 }
  0x24   :  { %1622 = vmatpush.bf16.msrb.mxu0 %v2168_v37  ;;  %v3210_v26 = vld [vmem:[%s4793_s3 + $0x6cc] sm:$0xf]  ;;  %v2953_v27 = vld [vmem:[%s4793_s3 + $0x6e4] sm:$0xf0]  ;;  %v3091_v28 = vld [vmem:[%s4793_s3 + $0x314] sm:$0xf]  ;;  %v2756_v31 = vor.u32 %v3164_v21, %v2755_v18  ;;  %v2732_v32 = vor.u32 %v3154_v22, %v2729_v23  ;;  %v2256_v34 = vor.u32 %v3035_v15, %v2253_v25 }
  0x25   :  { %1635 = vmatpush.bf16.msrb.mxu1 %v2392_v42  ;;  %v2477_v29 = vld [vmem:[%s4793_s3 + $0x32c] sm:$0xf0]  ;;  %v3028_v33 = vld [vmem:[%s4793_s3 + $0x11c] sm:$0xf]  ;;  %v2956_v35 = vor.u32 %v3210_v26, %v2953_v27  ;;  %v3147_v36 = vld [vmem:[%s4793_s3 + $0x4d4] sm:$0xf] }
  0x26   :  { %1648 = vmatpush.bf16.msrb.mxu2 %v2616_v48  ;;  %v2701_v37 = vld [vmem:[%s4793_s3 + $0x4ec] sm:$0xf0] }
  0x27   :  { %1661 = vmatpush.bf16.msrb.mxu3 %v2840_v50 }
  0x28   :  { %1623 = vmatpush.bf16.msrb.mxu0 %v2140_v49 }
  0x29   :  { %1636 = vmatpush.bf16.msrb.mxu1 %v2364_v54 }
  0x2a   :  { %1649 = vmatpush.bf16.msrb.mxu2 %v2588_v60 }
  0x2b   :  { %1662 = vmatpush.bf16.msrb.mxu3 %v2812_v63 }
  0x2c   :  { %1624 = vmatpush.bf16.msrb.mxu0 %v2112_v62 }
  0x2d   :  { %1637 = vmatpush.bf16.msrb.mxu1 %v2336_v3 }
  0x2e   :  { %1650 = vmatpush.bf16.msrb.mxu2 %v2560_v12 }
  0x2f   :  { %1663 = vmatpush.bf16.msrb.mxu3 %v2784_v14 }
  0x30   :  { %1625 = vmatpush.bf16.msrb.mxu0 %v2084_v13 }
  0x31   :  { %1638 = vmatpush.bf16.msrb.mxu1 %v2308_v19 }
  0x34   :  { %1670 = vmatpush.bf16.msra.mxu0 %v2284_v20 }
  0x35   :  { %10 = vsyncpa [#allocation3], 0  ;;  %1683 = vmatpush.bf16.msra.mxu1 %v2508_v24  ;;  %v2480_v38 = vor.u32 %v3091_v28, %v2477_v29  ;;  %v2225_v39 = vld [vmem:[%s4793_s3 + $0x134] sm:$0xf0]  ;;  %v3203_v40 = vld [vmem:[%s4793_s3 + $0x694] sm:$0xf]  ;;  %1651 = vmatpush.bf16.msrb.mxu2 %v2532_v30  ;;  %v2704_v44 = vor.u32 %v3147_v36, %v2701_v37 }
  0x36   :  { %v2925_v41 = vld [vmem:[%s4793_s3 + $0x6ac] sm:$0xf0]  ;;  %v3084_v42 = vld [vmem:[%s4793_s3 + $0x2dc] sm:$0xf]  ;;  %v2449_v43 = vld [vmem:[%s4793_s3 + $0x2f4] sm:$0xf0]  ;;  %1664 = vmatpush.bf16.msrb.mxu3 %v2756_v31  ;;  %v2228_v45 = vor.u32 %v3028_v33, %v2225_v39 }
  0x37   :  { %v2928_v46 = vor.u32 %v3203_v40, %v2925_v41  ;;  %v3021_v47 = vld [vmem:[%s4793_s3 + $0xe4] sm:$0xf]  ;;  %v3140_v48 = vld [vmem:[%s4793_s3 + $0x49c] sm:$0xf]  ;;  %v2673_v49 = vld [vmem:[%s4793_s3 + $0x4b4] sm:$0xf0]  ;;  %v2452_v50 = vor.u32 %v3084_v42, %v2449_v43 }
  0x38   :  { %1671 = vmatpush.bf16.msra.mxu0 %v2256_v34  ;;  %v2197_v51 = vld [vmem:[%s4793_s3 + $0xfc] sm:$0xf0]  ;;  %v3196_v52 = vld [vmem:[%s4793_s3 + $0x65c] sm:$0xf]  ;;  %v2897_v53 = vld [vmem:[%s4793_s3 + $0x674] sm:$0xf0]  ;;  %v2676_v56 = vor.u32 %v3140_v48, %v2673_v49 }
  0x39   :  { %1696 = vmatpush.bf16.msra.mxu2 %v2732_v32  ;;  %1684 = vmatpush.bf16.msra.mxu1 %v2480_v38  ;;  %v3077_v54 = vld [vmem:[%s4793_s3 + $0x2a4] sm:$0xf]  ;;  %v2421_v55 = vld [vmem:[%s4793_s3 + $0x2bc] sm:$0xf0]  ;;  %v2200_v57 = vor.u32 %v3021_v47, %v2197_v51  ;;  %v2900_v58 = vor.u32 %v3196_v52, %v2897_v53  ;;  %v3014_v59 = vld [vmem:[%s4793_s3 + $0xac] sm:$0xf] }
  0x3a   :  { %1709 = vmatpush.bf16.msra.mxu3 %v2956_v35  ;;  %v3133_v60 = vld [vmem:[%s4793_s3 + $0x464] sm:$0xf]  ;;  %v2645_v61 = vld [vmem:[%s4793_s3 + $0x47c] sm:$0xf0]  ;;  %v2424_v62 = vor.u32 %v3077_v54, %v2421_v55  ;;  %v2169_v63 = vld [vmem:[%s4793_s3 + $0xc4] sm:$0xf0] }
  0x3b   :  { %v3189_v0 = vld [vmem:[%s4793_s3 + $0x624] sm:$0xf]  ;;  %v2869_v1 = vld [vmem:[%s4793_s3 + $0x63c] sm:$0xf0]  ;;  %v3070_v2 = vld [vmem:[%s4793_s3 + $0x26c] sm:$0xf]  ;;  %v2648_v4 = vor.u32 %v3133_v60, %v2645_v61  ;;  %v2172_v5 = vor.u32 %v3014_v59, %v2169_v63 }
  0x3c   :  { %1672 = vmatpush.bf16.msra.mxu0 %v2228_v45  ;;  %v2393_v3 = vld [vmem:[%s4793_s3 + $0x284] sm:$0xf0]  ;;  %v2872_v6 = vor.u32 %v3189_v0, %v2869_v1  ;;  %v3007_v8 = vld [vmem:[%s4793_s3 + $0x74] sm:$0xf]  ;;  %v2141_v9 = vld [vmem:[%s4793_s3 + $0x8c] sm:$0xf0] }
  0x3d   :  { %1697 = vmatpush.bf16.msra.mxu2 %v2704_v44  ;;  %1685 = vmatpush.bf16.msra.mxu1 %v2452_v50  ;;  %v2396_v7 = vor.u32 %v3070_v2, %v2393_v3  ;;  %v3063_v10 = vld [vmem:[%s4793_s3 + $0x234] sm:$0xf]  ;;  %v2365_v11 = vld [vmem:[%s4793_s3 + $0x24c] sm:$0xf0]  ;;  %v2144_v12 = vor.u32 %v3007_v8, %v2141_v9  ;;  %v3126_v14 = vld [vmem:[%s4793_s3 + $0x42c] sm:$0xf] }
  0x3e   :  { %1710 = vmatpush.bf16.msra.mxu3 %v2928_v46  ;;  %v2368_v13 = vor.u32 %v3063_v10, %v2365_v11  ;;  %v2617_v15 = vld [vmem:[%s4793_s3 + $0x444] sm:$0xf0]  ;;  %v3182_v16 = vld [vmem:[%s4793_s3 + $0x5ec] sm:$0xf]  ;;  %v3000_v20 = vld [vmem:[%s4793_s3 + $0x3c] sm:$0xf] }
  0x3f   :  { %v2620_v17 = vor.u32 %v3126_v14, %v2617_v15  ;;  %v2841_v18 = vld [vmem:[%s4793_s3 + $0x604] sm:$0xf0]  ;;  %v2113_v21 = vld [vmem:[%s4793_s3 + $0x54] sm:$0xf0]  ;;  %v3056_v23 = vld [vmem:[%s4793_s3 + $0x1fc] sm:$0xf] }
  0x40   :  { %1673 = vmatpush.bf16.msra.mxu0 %v2200_v57  ;;  %v2844_v19 = vor.u32 %v3182_v16, %v2841_v18  ;;  %v2116_v22 = vor.u32 %v3000_v20, %v2113_v21  ;;  %v2337_v24 = vld [vmem:[%s4793_s3 + $0x214] sm:$0xf0]  ;;  %v3119_v26 = vld [vmem:[%s4793_s3 + $0x3f4] sm:$0xf]  ;;  %v2589_v27 = vld [vmem:[%s4793_s3 + $0x40c] sm:$0xf0] }
  0x41   :  { %1698 = vmatpush.bf16.msra.mxu2 %v2676_v56  ;;  %1686 = vmatpush.bf16.msra.mxu1 %v2424_v62  ;;  %v2340_v25 = vor.u32 %v3056_v23, %v2337_v24  ;;  %v3175_v28 = vld [vmem:[%s4793_s3 + $0x5b4] sm:$0xf]  ;;  %v2592_v29 = vor.u32 %v3119_v26, %v2589_v27  ;;  %v2813_v30 = vld [vmem:[%s4793_s3 + $0x5cc] sm:$0xf0]  ;;  %v2993_v32 = vld [vmem:[%s4793_s3 + $0x4] sm:$0xf] }
  0x42   :  { %1711 = vmatpush.bf16.msra.mxu3 %v2900_v58  ;;  %v2816_v31 = vor.u32 %v3175_v28, %v2813_v30  ;;  %v2085_v33 = vld [vmem:[%s4793_s3 + $0x1c] sm:$0xf0]  ;;  %v3049_v34 = vld [vmem:[%s4793_s3 + $0x1c4] sm:$0xf]  ;;  %v3112_v38 = vld [vmem:[%s4793_s3 + $0x3bc] sm:$0xf] }
  0x43   :  { %v2088_v35 = vor.u32 %v2993_v32, %v2085_v33  ;;  %v2309_v36 = vld [vmem:[%s4793_s3 + $0x1dc] sm:$0xf0]  ;;  %v2561_v39 = vld [vmem:[%s4793_s3 + $0x3d4] sm:$0xf0]  ;;  %v3168_v41 = vld [vmem:[%s4793_s3 + $0x57c] sm:$0xf] }
  0x44   :  { %1674 = vmatpush.bf16.msra.mxu0 %v2172_v5  ;;  %v2312_v37 = vor.u32 %v3049_v34, %v2309_v36  ;;  %v2564_v40 = vor.u32 %v3112_v38, %v2561_v39  ;;  %v2785_v42 = vld [vmem:[%s4793_s3 + $0x594] sm:$0xf0]  ;;  %v3105_v44 = vld [vmem:[%s4793_s3 + $0x384] sm:$0xf]  ;;  %v2533_v45 = vld [vmem:[%s4793_s3 + $0x39c] sm:$0xf0] }
  0x45   :  { %1699 = vmatpush.bf16.msra.mxu2 %v2648_v4  ;;  %1687 = vmatpush.bf16.msra.mxu1 %v2396_v7  ;;  %v2788_v43 = vor.u32 %v3168_v41, %v2785_v42  ;;  %v2536_v46 = vor.u32 %v3105_v44, %v2533_v45  ;;  %v3161_v47 = vld [vmem:[%s4793_s3 + $0x544] sm:$0xf]  ;;  %v2757_v48 = vld [vmem:[%s4793_s3 + $0x55c] sm:$0xf0]  ;;  %v2287_v56 = vld [vmem:[%s4793_s3 + $0x190] sm:$0xf] }
  0x46   :  { %1712 = vmatpush.bf16.msra.mxu3 %v2872_v6  ;;  %v2760_v49 = vor.u32 %v3161_v47, %v2757_v48  ;;  %v40_v50 = vld [vmem:[%s4792_s2] sm:$0xf]  ;;  %v3046_v57 = vld [vmem:[%s4793_s3 + $0x1a8] sm:$0xf0]  ;;  %v2511_v59 = vld [vmem:[%s4793_s3 + $0x350] sm:$0xf] }
  0x47   :  { %v42_v51 = vperm.slane %v40_v50, 0  ;;  %v43_v52 = vperm.slane %v40_v50, 1  ;;  %v3102_v60 = vld [vmem:[%s4793_s3 + $0x368] sm:$0xf0]  ;;  %v44_v63 = vperm.slane %v40_v50, 2  ;;  %v2288_v0 = vor.u32 %v3046_v57, %v2287_v56  ;;  %s2004_s20 = sshll.u32 %s4795_s5, 4  ;;  %s2005_s20 = int_to_ptr.hbm [resolvable:$true] %s2004_s20 }
  0x48   :  { %1675 = vmatpush.bf16.msra.mxu0 %v2144_v12  ;;  %v45_v2 = vperm.slane %v40_v50, 3  ;;  %v2512_v3 = vor.u32 %v3102_v60, %v2511_v59  ;;  %v2259_v4 = vld [vmem:[%s4793_s3 + $0x158] sm:$0xf]  ;;  %v3039_v5 = vld [vmem:[%s4793_s3 + $0x170] sm:$0xf0]  ;;  %vm1995_vm1 = vcmask 130048  }
  0x49   :  { %1688 = vmatpush.bf16.msra.mxu1 %v2368_v13  ;;  %1700 = vmatpush.bf16.msra.mxu2 %v2620_v17  ;;  %v2483_v7 = vld [vmem:[%s4793_s3 + $0x318] sm:$0xf]  ;;  %v3095_v8 = vld [vmem:[%s4793_s3 + $0x330] sm:$0xf0]  ;;  %v2260_v13 = vor.u32 %v3039_v5, %v2259_v4  ;;  %v2735_v14 = vld [vmem:[%s4793_s3 + $0x510] sm:$0xf] }
  0x4a   :  { %1713 = vmatpush.bf16.msra.mxu3 %v2844_v19  ;;  %v3158_v15 = vld [vmem:[%s4793_s3 + $0x528] sm:$0xf0]  ;;  %v2959_v16 = vld [vmem:[%s4793_s3 + $0x6d0] sm:$0xf]  ;;  %v2484_v19 = vor.u32 %v3095_v8, %v2483_v7  ;;  %v2231_v21 = vld [vmem:[%s4793_s3 + $0x120] sm:$0xf] }
  0x4b   :  { %v3214_v20 = vld [vmem:[%s4793_s3 + $0x6e8] sm:$0xf0]  ;;  %v2455_v24 = vld [vmem:[%s4793_s3 + $0x2e0] sm:$0xf]  ;;  %v2736_v27 = vor.u32 %v3158_v15, %v2735_v14  ;;  %v3151_v32 = vld [vmem:[%s4793_s3 + $0x4f0] sm:$0xf0] }
  0x4c   :  { %1676 = vmatpush.bf16.msra.mxu0 %v2116_v22  ;;  %v3032_v22 = vld [vmem:[%s4793_s3 + $0x138] sm:$0xf0]  ;;  %v2931_v33 = vld [vmem:[%s4793_s3 + $0x698] sm:$0xf]  ;;  %v3207_v36 = vld [vmem:[%s4793_s3 + $0x6b0] sm:$0xf0] }
  0x4d   :  { %1689 = vmatpush.bf16.msra.mxu1 %v2340_v25  ;;  %1701 = vmatpush.bf16.msra.mxu2 %v2592_v29  ;;  %v3088_v25 = vld [vmem:[%s4793_s3 + $0x2f8] sm:$0xf0]  ;;  %v2960_v29 = vor.u32 %v3214_v20, %v2959_v16  ;;  %v2232_v30 = vor.u32 %v3032_v22, %v2231_v21  ;;  %v3025_v38 = vld [vmem:[%s4793_s3 + $0x100] sm:$0xf0]  ;;  %v2427_v39 = vld [vmem:[%s4793_s3 + $0x2a8] sm:$0xf]  ;;  %v2932_v44 = vor.u32 %v3207_v36, %v2931_v33 }
  0x4e   :  { %1714 = vmatpush.bf16.msra.mxu3 %v2816_v31  ;;  %v2707_v31 = vld [vmem:[%s4793_s3 + $0x4d8] sm:$0xf]  ;;  %v3144_v47 = vld [vmem:[%s4793_s3 + $0x4b8] sm:$0xf0]  ;;  %v2651_v57 = vld [vmem:[%s4793_s3 + $0x468] sm:$0xf] }
  0x4f   :  { %v2708_v42 = vor.u32 %v3151_v32, %v2707_v31  ;;  %v3200_v50 = vld [vmem:[%s4793_s3 + $0x678] sm:$0xf0]  ;;  %v2623_v7 = vld [vmem:[%s4793_s3 + $0x430] sm:$0xf]  ;;  %v3130_v8 = vld [vmem:[%s4793_s3 + $0x448] sm:$0xf0] }
  0x50   :  { %1677 = vmatpush.bf16.msra.mxu0 %v2088_v35  ;;  %v2456_v35 = vor.u32 %v3088_v25, %v2455_v24  ;;  %v3004_v14 = vld [vmem:[%s4793_s3 + $0x58] sm:$0xf0]  ;;  %v2343_v15 = vld [vmem:[%s4793_s3 + $0x200] sm:$0xf]  ;;  %v3123_v20 = vld [vmem:[%s4793_s3 + $0x410] sm:$0xf0] }
  0x51   :  { %1690 = vmatpush.bf16.msra.mxu1 %v2312_v37  ;;  %1702 = vmatpush.bf16.msra.mxu2 %v2564_v40  ;;  %v2203_v37 = vld [vmem:[%s4793_s3 + $0xe8] sm:$0xf]  ;;  %v3081_v40 = vld [vmem:[%s4793_s3 + $0x2c0] sm:$0xf0]  ;;  %v3060_v16 = vld [vmem:[%s4793_s3 + $0x218] sm:$0xf0] }
  0x52   :  { %1715 = vmatpush.bf16.msra.mxu3 %v2788_v43  ;;  %v2204_v45 = vor.u32 %v3025_v38, %v2203_v37  ;;  %v2428_v48 = vor.u32 %v3081_v40, %v2427_v39  ;;  %v2819_v21 = vld [vmem:[%s4793_s3 + $0x5b8] sm:$0xf]  ;;  %v3179_v24 = vld [vmem:[%s4793_s3 + $0x5d0] sm:$0xf0]  ;;  %v2091_v25 = vld [vmem:[%s4793_s3 + $0x8] sm:$0xf] }
  0x53   :  { %v2289_v32 = vld [vmem:[%s4793_s3 + $0x1ac] sm:$0xf0]  ;;  %v3099_v33 = vld [vmem:[%s4793_s3 + $0x354] sm:$0xf]  ;;  %v2820_v36 = vor.u32 %v3179_v24, %v2819_v21  ;;  %v2567_v37 = vld [vmem:[%s4793_s3 + $0x3c0] sm:$0xf] }
  0x54   :  { %v3116_v38 = vld [vmem:[%s4793_s3 + $0x3d8] sm:$0xf0]  ;;  %v2905_v24 = vld [vmem:[%s4793_s3 + $0x67c] sm:$0xf0] }
  0x55   :  { %1703 = vmatpush.bf16.msra.mxu2 %v2536_v46  ;;  %v2679_v46 = vld [vmem:[%s4793_s3 + $0x4a0] sm:$0xf] }
  0x56   :  { %1716 = vmatpush.bf16.msra.mxu3 %v2760_v49  ;;  %v2903_v49 = vld [vmem:[%s4793_s3 + $0x660] sm:$0xf] }
  0x57   :  { %v2904_v56 = vor.u32 %v3200_v50, %v2903_v49  ;;  %v2485_v49 = vld [vmem:[%s4793_s3 + $0x334] sm:$0xf0] }
  0x90   :  { %v143_v53 = vpop.f32.mrf.mxu0 }
  0x91   :  { %v144_v54 = vadd.f32 %v143_v53, %v42_v51  ;;  %v156_v55 = vpop.f32.mrf.mxu1  ;;  %v2175_v51 = vld [vmem:[%s4793_s3 + $0xb0] sm:$0xf] }
  0x92   :  { %v157_v58 = vadd.f32 %v156_v55, %v43_v52  ;;  %v3018_v52 = vld [vmem:[%s4793_s3 + $0xc8] sm:$0xf0]  ;;  %v2399_v53 = vld [vmem:[%s4793_s3 + $0x270] sm:$0xf]  ;;  %v2680_v55 = vor.u32 %v3144_v47, %v2679_v46  ;;  %v2568_v46 = vor.u32 %v3116_v38, %v2567_v37  ;;  %v2261_v47 = vld [vmem:[%s4793_s3 + $0x174] sm:$0xf0] }
  0x93   :  { %v186_v61 = vmax.f32 %v144_v54, 0.0  ;;  %v3074_v54 = vld [vmem:[%s4793_s3 + $0x288] sm:$0xf0]  ;;  %v2176_v59 = vor.u32 %v3018_v52, %v2175_v51  ;;  %v2539_v51 = vld [vmem:[%s4793_s3 + $0x388] sm:$0xf] }
  0x94   :  { %v187_v62 = vmax.f32 %v157_v58, 0.0  ;;  %v3137_v58 = vld [vmem:[%s4793_s3 + $0x480] sm:$0xf0]  ;;  %v2400_v60 = vor.u32 %v3074_v54, %v2399_v53  ;;  %v2763_v53 = vld [vmem:[%s4793_s3 + $0x548] sm:$0xf] }
  0x95   :  { %v3791_v1 = vpack.c.bf16 %v186_v61, %v186_v61  ;;  %v2875_v61 = vld [vmem:[%s4793_s3 + $0x628] sm:$0xf]  ;;  %v2652_v4 = vor.u32 %v3137_v58, %v2651_v57  ;;  %v3109_v52 = vld [vmem:[%s4793_s3 + $0x3a0] sm:$0xf0]  ;;  %v3190_v37 = vld [vmem:[%s4793_s3 + $0x62c] sm:$0xf] }
  0x96   :  { %v3799_v6 = vpack.c.bf16 %v187_v62, %v187_v62  ;;  %v3193_v62 = vld [vmem:[%s4793_s3 + $0x640] sm:$0xf0]  ;;  %v2877_v38 = vld [vmem:[%s4793_s3 + $0x644] sm:$0xf0] }
  0x97   :  { %1626 = vmatmul.bf16.vlgmr.msrb.gmra.mxu0 %v3791_v1  ;;  %v2876_v5 = vor.u32 %v3193_v62, %v2875_v61  ;;  %v3165_v54 = vld [vmem:[%s4793_s3 + $0x560] sm:$0xf0]  ;;  %v2540_v62 = vor.u32 %v3109_v52, %v2539_v51  ;;  %v2121_v52 = vld [vmem:[%s4793_s3 + $0x5c] sm:$0xf0] }
  0x98   :  { %v169_v9 = vpop.f32.mrf.mxu2  ;;  %1639 = vmatmul.bf16.vlgmr.msrb.gmra.mxu1 %v3799_v6  ;;  %1722 = vmatpush.bf16.msrb.mxu0 %v2288_v0  ;;  %v145_v12 = vpop.f32.mrf.mxu0  ;;  %v3011_v0 = vld [vmem:[%s4793_s3 + $0x90] sm:$0xf0]  ;;  %v3029_v61 = vld [vmem:[%s4793_s3 + $0x124] sm:$0xf] }
  0x99   :  { %v170_v10 = vadd.f32 %v169_v9, %v44_v63  ;;  %v182_v11 = vpop.f32.mrf.mxu3  ;;  %1735 = vmatpush.bf16.msrb.mxu1 %v2512_v3  ;;  %v158_v18 = vpop.f32.mrf.mxu1  ;;  %v2147_v63 = vld [vmem:[%s4793_s3 + $0x78] sm:$0xf]  ;;  %v3067_v3 = vld [vmem:[%s4793_s3 + $0x250] sm:$0xf0]  ;;  %v3186_v12 = vld [vmem:[%s4793_s3 + $0x608] sm:$0xf0] }
  0x9a   :  { %v183_v17 = vadd.f32 %v182_v11, %v45_v2  ;;  %v2371_v2 = vld [vmem:[%s4793_s3 + $0x238] sm:$0xf]  ;;  %v2148_v9 = vor.u32 %v3011_v0, %v2147_v63  ;;  %v2847_v11 = vld [vmem:[%s4793_s3 + $0x5f0] sm:$0xf]  ;;  %v2233_v63 = vld [vmem:[%s4793_s3 + $0x13c] sm:$0xf0] }
  0x9b   :  { %v188_v23 = vmax.f32 %v170_v10, 0.0  ;;  %v2372_v10 = vor.u32 %v3067_v3, %v2371_v2  ;;  %v2848_v18 = vor.u32 %v3186_v12, %v2847_v11  ;;  %v3085_v0 = vld [vmem:[%s4793_s3 + $0x2e4] sm:$0xf]  ;;  %v2457_v2 = vld [vmem:[%s4793_s3 + $0x2fc] sm:$0xf0]  ;;  %v2764_v3 = vor.u32 %v3165_v54, %v2763_v53 }
  0x9c   :  { %v189_v26 = vmax.f32 %v183_v17, 0.0  ;;  %1723 = vmatpush.bf16.msrb.mxu0 %v2260_v13  ;;  %v2119_v13 = vld [vmem:[%s4793_s3 + $0x40] sm:$0xf]  ;;  %v2624_v17 = vor.u32 %v3130_v8, %v2623_v7  ;;  %v3148_v7 = vld [vmem:[%s4793_s3 + $0x4dc] sm:$0xf] }
  0x9d   :  { %v3833_v28 = vpack.c.bf16 %v188_v23, %v188_v23  ;;  %1736 = vmatpush.bf16.msrb.mxu1 %v2484_v19  ;;  %v2595_v19 = vld [vmem:[%s4793_s3 + $0x3f8] sm:$0xf]  ;;  %v2120_v22 = vor.u32 %v3004_v14, %v2119_v13  ;;  %v2344_v23 = vor.u32 %v3060_v16, %v2343_v15  ;;  %v3204_v11 = vld [vmem:[%s4793_s3 + $0x69c] sm:$0xf]  ;;  %v3022_v13 = vld [vmem:[%s4793_s3 + $0xec] sm:$0xf] }
  0x9e   :  { %v3844_v34 = vpack.c.bf16 %v189_v26, %v189_v26  ;;  %v2997_v26 = vld [vmem:[%s4793_s3 + $0x20] sm:$0xf0]  ;;  %v2596_v31 = vor.u32 %v3123_v20, %v2595_v19  ;;  %v2709_v8 = vld [vmem:[%s4793_s3 + $0x4f4] sm:$0xf0]  ;;  %v2205_v14 = vld [vmem:[%s4793_s3 + $0x104] sm:$0xf0] }
  0x9f   :  { %1652 = vmatmul.bf16.vlgmr.msrb.gmra.mxu2 %v3833_v28  ;;  %v2092_v39 = vor.u32 %v2997_v26, %v2091_v25  ;;  %v2933_v12 = vld [vmem:[%s4793_s3 + $0x6b4] sm:$0xf0]  ;;  %v3078_v15 = vld [vmem:[%s4793_s3 + $0x2ac] sm:$0xf]  ;;  %v2429_v16 = vld [vmem:[%s4793_s3 + $0x2c4] sm:$0xf0]  ;;  %v2208_v21 = vor.u32 %v3022_v13, %v2205_v14 }
  0xa0   :  { %1665 = vmatmul.bf16.vlgmr.msrb.gmra.mxu3 %v3844_v34  ;;  %1748 = vmatpush.bf16.msrb.mxu2 %v2736_v27  ;;  %v171_v41 = vpop.f32.mrf.mxu2  ;;  %v2315_v27 = vld [vmem:[%s4793_s3 + $0x1c8] sm:$0xf]  ;;  %v3141_v19 = vld [vmem:[%s4793_s3 + $0x4a4] sm:$0xf]  ;;  %v2681_v20 = vld [vmem:[%s4793_s3 + $0x4bc] sm:$0xf0] }
  0xa1   :  { %1761 = vmatpush.bf16.msrb.mxu3 %v2960_v29  ;;  %v184_v43 = vpop.f32.mrf.mxu3  ;;  %1724 = vmatpush.bf16.msrb.mxu0 %v2232_v30  ;;  %v3053_v29 = vld [vmem:[%s4793_s3 + $0x1e0] sm:$0xf0]  ;;  %v3043_v30 = vld [vmem:[%s4793_s3 + $0x194] sm:$0xf]  ;;  %v2791_v41 = vld [vmem:[%s4793_s3 + $0x580] sm:$0xf] }
  0xa2   :  { %1737 = vmatpush.bf16.msrb.mxu1 %v2456_v35  ;;  %v2513_v35 = vld [vmem:[%s4793_s3 + $0x36c] sm:$0xf0]  ;;  %v2316_v40 = vor.u32 %v3053_v29, %v2315_v27  ;;  %v2292_v43 = vor.u32 %v3043_v30, %v2289_v32  ;;  %v3015_v25 = vld [vmem:[%s4793_s3 + $0xb4] sm:$0xf]  ;;  %v2684_v30 = vor.u32 %v3141_v19, %v2681_v20  ;;  %v3134_v32 = vld [vmem:[%s4793_s3 + $0x46c] sm:$0xf] }
  0xa3   :  { %v2177_v26 = vld [vmem:[%s4793_s3 + $0xcc] sm:$0xf0]  ;;  %v3071_v27 = vld [vmem:[%s4793_s3 + $0x274] sm:$0xf]  ;;  %v3001_v51 = vld [vmem:[%s4793_s3 + $0x44] sm:$0xf] }
  0xa4   :  { %1749 = vmatpush.bf16.msrb.mxu2 %v2708_v42  ;;  %v3172_v42 = vld [vmem:[%s4793_s3 + $0x598] sm:$0xf0]  ;;  %v2401_v29 = vld [vmem:[%s4793_s3 + $0x28c] sm:$0xf0]  ;;  %v3057_v53 = vld [vmem:[%s4793_s3 + $0x204] sm:$0xf] }
  0xa5   :  { %1762 = vmatpush.bf16.msrb.mxu3 %v2932_v44  ;;  %1725 = vmatpush.bf16.msrb.mxu0 %v2204_v45  ;;  %v2516_v44 = vor.u32 %v3099_v33, %v2513_v35  ;;  %v3036_v45 = vld [vmem:[%s4793_s3 + $0x15c] sm:$0xf]  ;;  %v2792_v50 = vor.u32 %v3172_v42, %v2791_v41  ;;  %v2653_v33 = vld [vmem:[%s4793_s3 + $0x484] sm:$0xf0]  ;;  %v2180_v35 = vor.u32 %v3015_v25, %v2177_v26  ;;  %v2373_v42 = vld [vmem:[%s4793_s3 + $0x254] sm:$0xf0] }
  0xa6   :  { %1738 = vmatpush.bf16.msrb.mxu1 %v2428_v48  ;;  %v3092_v48 = vld [vmem:[%s4793_s3 + $0x31c] sm:$0xf]  ;;  %v2264_v57 = vor.u32 %v3036_v45, %v2261_v47  ;;  %v3127_v45 = vld [vmem:[%s4793_s3 + $0x434] sm:$0xf]  ;;  %v2345_v54 = vld [vmem:[%s4793_s3 + $0x21c] sm:$0xf0] }
  0xa7   :  { %1678 = vmatmul.bf16.vlgmr.msra.gmra.mxu0 %v3791_v1  ;;  %v2488_v58 = vor.u32 %v3092_v48, %v2485_v49  ;;  %v3064_v41 = vld [vmem:[%s4793_s3 + $0x23c] sm:$0xf]  ;;  %v3183_v49 = vld [vmem:[%s4793_s3 + $0x5f4] sm:$0xf]  ;;  %v2267_v19 = vld [vmem:[%s4793_s3 + $0x160] sm:$0xf] }
  0xa8   :  { %1750 = vmatpush.bf16.msrb.mxu2 %v2680_v55  ;;  %1691 = vmatmul.bf16.vlgmr.msra.gmra.mxu1 %v3799_v6  ;;  %v3155_v55 = vld [vmem:[%s4793_s3 + $0x514] sm:$0xf]  ;;  %v2376_v48 = vor.u32 %v3064_v41, %v2373_v42  ;;  %v3106_v25 = vld [vmem:[%s4793_s3 + $0x38c] sm:$0xf]  ;;  %v2541_v26 = vld [vmem:[%s4793_s3 + $0x3a4] sm:$0xf0] }
  0xa9   :  { %1763 = vmatpush.bf16.msrb.mxu3 %v2904_v56  ;;  %1726 = vmatpush.bf16.msrb.mxu0 %v2176_v59  ;;  %v2737_v56 = vld [vmem:[%s4793_s3 + $0x52c] sm:$0xf0]  ;;  %v3211_v59 = vld [vmem:[%s4793_s3 + $0x6d4] sm:$0xf]  ;;  %v2463_v42 = vld [vmem:[%s4793_s3 + $0x2e8] sm:$0xf] }
  0xaa   :  { %1739 = vmatpush.bf16.msrb.mxu1 %v2400_v60  ;;  %v2961_v60 = vld [vmem:[%s4793_s3 + $0x6ec] sm:$0xf0] }
  0xac   :  { %1751 = vmatpush.bf16.msrb.mxu2 %v2652_v4  ;;  %v2740_v4 = vor.u32 %v3155_v55, %v2737_v56 }
  0xad   :  { %1764 = vmatpush.bf16.msrb.mxu3 %v2876_v5  ;;  %1727 = vmatpush.bf16.msrb.mxu0 %v2148_v9  ;;  %v2964_v5 = vor.u32 %v3211_v59, %v2961_v60  ;;  %v2236_v9 = vor.u32 %v3029_v61, %v2233_v63  ;;  %v3176_v59 = vld [vmem:[%s4793_s3 + $0x5bc] sm:$0xf]  ;;  %v2124_v60 = vor.u32 %v3001_v51, %v2121_v52  ;;  %v2994_v63 = vld [vmem:[%s4793_s3 + $0xc] sm:$0xf]  ;;  %v2211_v51 = vld [vmem:[%s4793_s3 + $0xf0] sm:$0xf] }
  0xae   :  { %1740 = vmatpush.bf16.msrb.mxu1 %v2372_v10  ;;  %v2460_v10 = vor.u32 %v3085_v0, %v2457_v2  ;;  %v2348_v61 = vor.u32 %v3057_v53, %v2345_v54  ;;  %v2093_v0 = vld [vmem:[%s4793_s3 + $0x24] sm:$0xf0]  ;;  %v3050_v2 = vld [vmem:[%s4793_s3 + $0x1cc] sm:$0xf]  ;;  %v2435_v54 = vld [vmem:[%s4793_s3 + $0x2b0] sm:$0xf] }
  0xaf   :  { %1704 = vmatmul.bf16.vlgmr.msra.gmra.mxu2 %v3833_v28  ;;  %v2096_v13 = vor.u32 %v2994_v63, %v2093_v0  ;;  %v3026_v52 = vld [vmem:[%s4793_s3 + $0x108] sm:$0xf0]  ;;  %v2183_v63 = vld [vmem:[%s4793_s3 + $0xb8] sm:$0xf]  ;;  %v3019_v0 = vld [vmem:[%s4793_s3 + $0xd0] sm:$0xf0] }
  0xb0   :  { %1717 = vmatmul.bf16.vlgmr.msra.gmra.mxu3 %v3844_v34  ;;  %1752 = vmatpush.bf16.msrb.mxu2 %v2624_v17  ;;  %v2712_v17 = vor.u32 %v3148_v7, %v2709_v8  ;;  %v3047_v7 = vld [vmem:[%s4793_s3 + $0x1b0] sm:$0xf0]  ;;  %v2519_v8 = vld [vmem:[%s4793_s3 + $0x358] sm:$0xf] }
  0xb1   :  { %1765 = vmatpush.bf16.msrb.mxu3 %v2848_v18  ;;  %1728 = vmatpush.bf16.msrb.mxu0 %v2120_v22  ;;  %v2936_v18 = vor.u32 %v3204_v11, %v2933_v12  ;;  %v2432_v22 = vor.u32 %v3078_v15, %v2429_v16  ;;  %v3113_v11 = vld [vmem:[%s4793_s3 + $0x3c4] sm:$0xf]  ;;  %v2569_v12 = vld [vmem:[%s4793_s3 + $0x3dc] sm:$0xf0] }
  0xb2   :  { %1741 = vmatpush.bf16.msrb.mxu1 %v2344_v23  ;;  %v3197_v23 = vld [vmem:[%s4793_s3 + $0x664] sm:$0xf]  ;;  %v2793_v16 = vld [vmem:[%s4793_s3 + $0x59c] sm:$0xf0]  ;;  %v2572_v20 = vor.u32 %v3113_v11, %v2569_v12  ;;  %v3194_v11 = vld [vmem:[%s4793_s3 + $0x648] sm:$0xf0] }
  0xb3   :  { %v3169_v15 = vld [vmem:[%s4793_s3 + $0x584] sm:$0xf] }
  0xb4   :  { %1753 = vmatpush.bf16.msrb.mxu2 %v2596_v31  ;;  %v2908_v31 = vor.u32 %v3197_v23, %v2905_v24  ;;  %v3096_v23 = vld [vmem:[%s4793_s3 + $0x338] sm:$0xf0]  ;;  %v2796_v24 = vor.u32 %v3169_v15, %v2793_v16  ;;  %v2379_v16 = vld [vmem:[%s4793_s3 + $0x240] sm:$0xf] }
  0xb5   :  { %1766 = vmatpush.bf16.msrb.mxu3 %v2820_v36  ;;  %1729 = vmatpush.bf16.msrb.mxu0 %v2092_v39  ;;  %v2404_v36 = vor.u32 %v3071_v27, %v2401_v29  ;;  %v3008_v39 = vld [vmem:[%s4793_s3 + $0x7c] sm:$0xf]  ;;  %v3162_v27 = vld [vmem:[%s4793_s3 + $0x54c] sm:$0xf]  ;;  %v2765_v29 = vld [vmem:[%s4793_s3 + $0x564] sm:$0xf0] }
  0xb6   :  { %1742 = vmatpush.bf16.msrb.mxu1 %v2316_v40  ;;  %v2149_v40 = vld [vmem:[%s4793_s3 + $0x94] sm:$0xf0] }
  0xb7   :  { %v2152_v47 = vor.u32 %v3008_v39, %v2149_v40  ;;  %v3033_v39 = vld [vmem:[%s4793_s3 + $0x140] sm:$0xf0]  ;;  %v2768_v40 = vor.u32 %v3162_v27, %v2765_v29  ;;  %v2351_v29 = vld [vmem:[%s4793_s3 + $0x208] sm:$0xf] }
  0xb8   :  { %1754 = vmatpush.bf16.msrb.mxu2 %v2568_v46  ;;  %1730 = vmatmul.bf16.vlgmr.msrb.gmra.mxu0 %v3791_v1  ;;  %v2625_v46 = vld [vmem:[%s4793_s3 + $0x44c] sm:$0xf0] }
  0xb9   :  { %1774 = vmatpush.bf16.msra.mxu0 %v2292_v43  ;;  %1767 = vmatpush.bf16.msrb.mxu3 %v2792_v50  ;;  %v2656_v43 = vor.u32 %v3134_v32, %v2653_v33  ;;  %v2849_v50 = vld [vmem:[%s4793_s3 + $0x60c] sm:$0xf0]  ;;  %v2628_v55 = vor.u32 %v3127_v45, %v2625_v46  ;;  %v2715_v45 = vld [vmem:[%s4793_s3 + $0x4e0] sm:$0xf]  ;;  %v3152_v46 = vld [vmem:[%s4793_s3 + $0x4f8] sm:$0xf0] }
  0xba   :  { %1787 = vmatpush.bf16.msra.mxu1 %v2516_v44  ;;  %v2880_v44 = vor.u32 %v3190_v37, %v2877_v38  ;;  %v2852_v56 = vor.u32 %v3183_v49, %v2849_v50  ;;  %v2544_v37 = vor.u32 %v3106_v25, %v2541_v26  ;;  %v2239_v38 = vld [vmem:[%s4793_s3 + $0x128] sm:$0xf]  ;;  %v3208_v49 = vld [vmem:[%s4793_s3 + $0x6b8] sm:$0xf0]  ;;  %v2716_v53 = vor.u32 %v3152_v46, %v2715_v45  ;;  %v3005_v26 = vld [vmem:[%s4793_s3 + $0x60] sm:$0xf0] }
  0xbb   :  { %1743 = vmatmul.bf16.vlgmr.msrb.gmra.mxu1 %v3799_v6  ;;  %v2127_v25 = vld [vmem:[%s4793_s3 + $0x48] sm:$0xf]  ;;  %v2297_v45 = vld [vmem:[%s4793_s3 + $0x1b4] sm:$0xf0]  ;;  %v3100_v46 = vld [vmem:[%s4793_s3 + $0x35c] sm:$0xf] }
  0xbc   :  { %1755 = vmatpush.bf16.msrb.mxu2 %v2540_v62  ;;  %v2821_v62 = vld [vmem:[%s4793_s3 + $0x5d4] sm:$0xf0] }
  0xbd   :  { %1775 = vmatpush.bf16.msra.mxu0 %v2264_v57  ;;  %1768 = vmatpush.bf16.msrb.mxu3 %v2764_v3  ;;  %v3120_v57 = vld [vmem:[%s4793_s3 + $0x3fc] sm:$0xf]  ;;  %v2317_v3 = vld [vmem:[%s4793_s3 + $0x1e4] sm:$0xf0] }
  0xbe   :  { %1788 = vmatpush.bf16.msra.mxu1 %v2488_v58  ;;  %v2597_v58 = vld [vmem:[%s4793_s3 + $0x414] sm:$0xf0]  ;;  %v2320_v14 = vor.u32 %v3050_v2, %v2317_v3 }
  0xbf   :  { %1756 = vmatmul.bf16.vlgmr.msrb.gmra.mxu2 %v3833_v28  ;;  %v2407_v3 = vld [vmem:[%s4793_s3 + $0x278] sm:$0xf] }
  0xc0   :  { %1800 = vmatpush.bf16.msra.mxu2 %v2740_v4  ;;  %1769 = vmatmul.bf16.vlgmr.msrb.gmra.mxu3 %v3844_v34  ;;  %v2295_v4 = vld [vmem:[%s4793_s3 + $0x198] sm:$0xf] }
  0xc1   :  { %1813 = vmatpush.bf16.msra.mxu3 %v2964_v5  ;;  %1776 = vmatpush.bf16.msra.mxu0 %v2236_v9  ;;  %v2600_v5 = vor.u32 %v3120_v57, %v2597_v58  ;;  %v3103_v9 = vld [vmem:[%s4793_s3 + $0x370] sm:$0xf0]  ;;  %v2687_v57 = vld [vmem:[%s4793_s3 + $0x4a8] sm:$0xf]  ;;  %v3145_v58 = vld [vmem:[%s4793_s3 + $0x4c0] sm:$0xf0] }
  0xc2   :  { %1789 = vmatpush.bf16.msra.mxu1 %v2460_v10  ;;  %v2824_v10 = vor.u32 %v3176_v59, %v2821_v62  ;;  %v2212_v59 = vor.u32 %v3026_v52, %v2211_v51  ;;  %v2688_v2 = vor.u32 %v3145_v58, %v2687_v57  ;;  %v2799_v52 = vld [vmem:[%s4793_s3 + $0x588] sm:$0xf] }
  0xc4   :  { %1801 = vmatpush.bf16.msra.mxu2 %v2712_v17  ;;  %v2296_v17 = vor.u32 %v3047_v7, %v2295_v4  ;;  %v3075_v4 = vld [vmem:[%s4793_s3 + $0x290] sm:$0xf0]  ;;  %v2659_v7 = vld [vmem:[%s4793_s3 + $0x470] sm:$0xf] }
  0xc5   :  { %1814 = vmatpush.bf16.msra.mxu3 %v2936_v18  ;;  %1777 = vmatpush.bf16.msra.mxu0 %v2208_v21  ;;  %v2520_v18 = vor.u32 %v3103_v9, %v2519_v8  ;;  %v3040_v21 = vld [vmem:[%s4793_s3 + $0x178] sm:$0xf0]  ;;  %v3138_v8 = vld [vmem:[%s4793_s3 + $0x488] sm:$0xf0]  ;;  %v2184_v9 = vor.u32 %v3019_v0, %v2183_v63  ;;  %v2408_v12 = vor.u32 %v3075_v4, %v2407_v3  ;;  %v2547_v63 = vld [vmem:[%s4793_s3 + $0x390] sm:$0xf] }
  0xc6   :  { %1790 = vmatpush.bf16.msra.mxu1 %v2432_v22  ;;  %v2491_v22 = vld [vmem:[%s4793_s3 + $0x320] sm:$0xf]  ;;  %v2268_v32 = vor.u32 %v3040_v21, %v2267_v19  ;;  %v2660_v15 = vor.u32 %v3138_v8, %v2659_v7  ;;  %v2631_v19 = vld [vmem:[%s4793_s3 + $0x438] sm:$0xf]  ;;  %v3110_v0 = vld [vmem:[%s4793_s3 + $0x3a8] sm:$0xf0] }
  0xc7   :  { %v2492_v33 = vor.u32 %v3096_v23, %v2491_v22  ;;  %v2855_v22 = vld [vmem:[%s4793_s3 + $0x5f8] sm:$0xf]  ;;  %v3187_v23 = vld [vmem:[%s4793_s3 + $0x610] sm:$0xf0]  ;;  %v3166_v3 = vld [vmem:[%s4793_s3 + $0x568] sm:$0xf0] }
  0xc8   :  { %1802 = vmatpush.bf16.msra.mxu2 %v2684_v30  ;;  %v2743_v30 = vld [vmem:[%s4793_s3 + $0x518] sm:$0xf]  ;;  %v3156_v4 = vld [vmem:[%s4793_s3 + $0x51c] sm:$0xf] }
  0xc9   :  { %1815 = vmatpush.bf16.msra.mxu3 %v2908_v31  ;;  %1778 = vmatpush.bf16.msra.mxu0 %v2180_v35  ;;  %v3159_v31 = vld [vmem:[%s4793_s3 + $0x530] sm:$0xf0]  ;;  %v2967_v35 = vld [vmem:[%s4793_s3 + $0x6d8] sm:$0xf]  ;;  %v3212_v8 = vld [vmem:[%s4793_s3 + $0x6dc] sm:$0xf] }
  0xca   :  { %1791 = vmatpush.bf16.msra.mxu1 %v2404_v36  ;;  %v3215_v36 = vld [vmem:[%s4793_s3 + $0x6f0] sm:$0xf0]  ;;  %v2744_v41 = vor.u32 %v3159_v31, %v2743_v30  ;;  %v3061_v30 = vld [vmem:[%s4793_s3 + $0x220] sm:$0xf0]  ;;  %v2856_v31 = vor.u32 %v3187_v23, %v2855_v22  ;;  %v2941_v23 = vld [vmem:[%s4793_s3 + $0x6bc] sm:$0xf0] }
  0xcb   :  { %v3205_v22 = vld [vmem:[%s4793_s3 + $0x6a4] sm:$0xf] }
  0xcc   :  { %1803 = vmatpush.bf16.msra.mxu2 %v2656_v43  ;;  %v3089_v43 = vld [vmem:[%s4793_s3 + $0x300] sm:$0xf0] }
  0xcd   :  { %1816 = vmatpush.bf16.msra.mxu3 %v2880_v44  ;;  %1779 = vmatpush.bf16.msra.mxu0 %v2152_v47  ;;  %v2968_v44 = vor.u32 %v3215_v36, %v2967_v35  ;;  %v2240_v47 = vor.u32 %v3033_v39, %v2239_v38  ;;  %v2464_v50 = vor.u32 %v3089_v43, %v2463_v42  ;;  %v2827_v36 = vld [vmem:[%s4793_s3 + $0x5c0] sm:$0xf]  ;;  %v2099_v38 = vld [vmem:[%s4793_s3 + $0x10] sm:$0xf]  ;;  %v3054_v42 = vld [vmem:[%s4793_s3 + $0x1e8] sm:$0xf0] }
  0xce   :  { %1792 = vmatpush.bf16.msra.mxu1 %v2376_v48  ;;  %v2939_v48 = vld [vmem:[%s4793_s3 + $0x6a0] sm:$0xf]  ;;  %v2128_v35 = vor.u32 %v3005_v26, %v2127_v25  ;;  %v2352_v39 = vor.u32 %v3061_v30, %v2351_v29  ;;  %v3023_v25 = vld [vmem:[%s4793_s3 + $0xf4] sm:$0xf]  ;;  %v2213_v26 = vld [vmem:[%s4793_s3 + $0x10c] sm:$0xf0] }
  0xcf   :  { %v3079_v29 = vld [vmem:[%s4793_s3 + $0x2b4] sm:$0xf]  ;;  %v2437_v30 = vld [vmem:[%s4793_s3 + $0x2cc] sm:$0xf0] }
  0xd0   :  { %1804 = vmatpush.bf16.msra.mxu2 %v2628_v55  ;;  %v3082_v55 = vld [vmem:[%s4793_s3 + $0x2c8] sm:$0xf0] }
  0xd1   :  { %1817 = vmatpush.bf16.msra.mxu3 %v2852_v56  ;;  %1780 = vmatpush.bf16.msra.mxu0 %v2124_v60  ;;  %v2940_v56 = vor.u32 %v3208_v49, %v2939_v48  ;;  %v2911_v60 = vld [vmem:[%s4793_s3 + $0x668] sm:$0xf]  ;;  %v2436_v62 = vor.u32 %v3082_v55, %v2435_v54  ;;  %v2521_v48 = vld [vmem:[%s4793_s3 + $0x374] sm:$0xf0] }
  0xd2   :  { %1793 = vmatpush.bf16.msra.mxu1 %v2348_v61  ;;  %v3201_v61 = vld [vmem:[%s4793_s3 + $0x680] sm:$0xf0]  ;;  %v2575_v49 = vld [vmem:[%s4793_s3 + $0x3c8] sm:$0xf]  ;;  %v2524_v57 = vor.u32 %v3100_v46, %v2521_v48  ;;  %v2661_v46 = vld [vmem:[%s4793_s3 + $0x48c] sm:$0xf0] }
  0xd3   :  { %v3191_v48 = vld [vmem:[%s4793_s3 + $0x634] sm:$0xf] }
  0xd4   :  { %1805 = vmatpush.bf16.msra.mxu2 %v2600_v5  ;;  %v2912_v5 = vor.u32 %v3201_v61, %v2911_v60  ;;  %v3093_v60 = vld [vmem:[%s4793_s3 + $0x324] sm:$0xf]  ;;  %v2493_v61 = vld [vmem:[%s4793_s3 + $0x33c] sm:$0xf0] }
  0xd5   :  { %1818 = vmatpush.bf16.msra.mxu3 %v2824_v10  ;;  %1781 = vmatpush.bf16.msra.mxu0 %v2096_v13  ;;  %v2883_v10 = vld [vmem:[%s4793_s3 + $0x630] sm:$0xf]  ;;  %v2155_v13 = vld [vmem:[%s4793_s3 + $0x80] sm:$0xf] }
  0xd6   :  { %1794 = vmatpush.bf16.msra.mxu1 %v2320_v14  ;;  %v3012_v14 = vld [vmem:[%s4793_s3 + $0x98] sm:$0xf0] }
  0xd7   :  { %v2156_v21 = vor.u32 %v3012_v14, %v2155_v13  ;;  %v2241_v13 = vld [vmem:[%s4793_s3 + $0x144] sm:$0xf0] }
  0xd8   :  { %1806 = vmatpush.bf16.msra.mxu2 %v2572_v20  ;;  %1782 = vmatmul.bf16.vlgmr.msra.gmra.mxu0 %v3791_v1  ;;  %v3131_v20 = vld [vmem:[%s4793_s3 + $0x450] sm:$0xf0] }
  0xd9   :  { %1826 = vmatpush.bf16.msrb.mxu0 %v2296_v17  ;;  %1819 = vmatpush.bf16.msra.mxu3 %v2796_v24  ;;  %v3068_v17 = vld [vmem:[%s4793_s3 + $0x258] sm:$0xf0]  ;;  %v2632_v27 = vor.u32 %v3131_v20, %v2631_v19  ;;  %v3149_v19 = vld [vmem:[%s4793_s3 + $0x4e4] sm:$0xf]  ;;  %v2717_v20 = vld [vmem:[%s4793_s3 + $0x4fc] sm:$0xf0] }
  0xda   :  { %1839 = vmatpush.bf16.msrb.mxu1 %v2520_v18  ;;  %v2884_v18 = vor.u32 %v3194_v11, %v2883_v10  ;;  %v2380_v24 = vor.u32 %v3068_v17, %v2379_v16  ;;  %v2496_v10 = vor.u32 %v3093_v60, %v2493_v61  ;;  %v2548_v11 = vor.u32 %v3110_v0, %v2547_v63  ;;  %v3086_v16 = vld [vmem:[%s4793_s3 + $0x2ec] sm:$0xf]  ;;  %v2465_v17 = vld [vmem:[%s4793_s3 + $0x304] sm:$0xf0]  ;;  %v3184_v60 = vld [vmem:[%s4793_s3 + $0x5fc] sm:$0xf] }
  0xdb   :  { %1795 = vmatmul.bf16.vlgmr.msra.gmra.mxu1 %v3799_v6  ;;  %v2857_v61 = vld [vmem:[%s4793_s3 + $0x614] sm:$0xf0]  ;;  %v3002_v63 = vld [vmem:[%s4793_s3 + $0x4c] sm:$0xf]  ;;  %v2129_v0 = vld [vmem:[%s4793_s3 + $0x64] sm:$0xf0] }
  0xdc   :  { %1807 = vmatpush.bf16.msra.mxu2 %v2544_v37  ;;  %v3180_v37 = vld [vmem:[%s4793_s3 + $0x5d8] sm:$0xf0] }
  0xdd   :  { %1827 = vmatpush.bf16.msrb.mxu0 %v2268_v32  ;;  %1820 = vmatpush.bf16.msra.mxu3 %v2768_v40  ;;  %v2603_v32 = vld [vmem:[%s4793_s3 + $0x400] sm:$0xf]  ;;  %v2998_v40 = vld [vmem:[%s4793_s3 + $0x28] sm:$0xf0] }
  0xde   :  { %1840 = vmatpush.bf16.msrb.mxu1 %v2492_v33  ;;  %v3124_v33 = vld [vmem:[%s4793_s3 + $0x418] sm:$0xf0]  ;;  %v2100_v51 = vor.u32 %v2998_v40, %v2099_v38  ;;  %v2440_v38 = vor.u32 %v3079_v29, %v2437_v30  ;;  %v2185_v40 = vld [vmem:[%s4793_s3 + $0xd4] sm:$0xf0] }
  0xdf   :  { %1808 = vmatmul.bf16.vlgmr.msra.gmra.mxu2 %v3833_v28  ;;  %v2604_v43 = vor.u32 %v3124_v33, %v2603_v32  ;;  %v3142_v32 = vld [vmem:[%s4793_s3 + $0x4ac] sm:$0xf]  ;;  %v2689_v33 = vld [vmem:[%s4793_s3 + $0x4c4] sm:$0xf0] }
  0xe0   :  { %1852 = vmatpush.bf16.msrb.mxu2 %v2744_v41  ;;  %1821 = vmatmul.bf16.vlgmr.msra.gmra.mxu3 %v3844_v34  ;;  %v2323_v41 = vld [vmem:[%s4793_s3 + $0x1d0] sm:$0xf] }
  0xe1   :  { %1865 = vmatpush.bf16.msrb.mxu3 %v2968_v44  ;;  %1828 = vmatpush.bf16.msrb.mxu0 %v2240_v47  ;;  %v3044_v44 = vld [vmem:[%s4793_s3 + $0x19c] sm:$0xf]  ;;  %v2828_v47 = vor.u32 %v3180_v37, %v2827_v36  ;;  %v2324_v54 = vor.u32 %v3054_v42, %v2323_v41  ;;  %v3198_v36 = vld [vmem:[%s4793_s3 + $0x66c] sm:$0xf]  ;;  %v2913_v37 = vld [vmem:[%s4793_s3 + $0x684] sm:$0xf0]  ;;  %v2692_v41 = vor.u32 %v3142_v32, %v2689_v33 }
  0xe2   :  { %1841 = vmatpush.bf16.msrb.mxu1 %v2464_v50  ;;  %v3117_v50 = vld [vmem:[%s4793_s3 + $0x3e0] sm:$0xf0]  ;;  %v2300_v55 = vor.u32 %v3044_v44, %v2297_v45  ;;  %v3072_v42 = vld [vmem:[%s4793_s3 + $0x27c] sm:$0xf]  ;;  %v2916_v44 = vor.u32 %v3198_v36, %v2913_v37  ;;  %v3135_v45 = vld [vmem:[%s4793_s3 + $0x474] sm:$0xf] }
  0xe3   :  { %v2576_v58 = vor.u32 %v3117_v50, %v2575_v49  ;;  %v2885_v49 = vld [vmem:[%s4793_s3 + $0x64c] sm:$0xf0]  ;;  %v2499_v36 = vld [vmem:[%s4793_s3 + $0x328] sm:$0xf]  ;;  %v3097_v37 = vld [vmem:[%s4793_s3 + $0x340] sm:$0xf0] }
  0xe4   :  { %1853 = vmatpush.bf16.msrb.mxu2 %v2716_v53  ;;  %v3173_v53 = vld [vmem:[%s4793_s3 + $0x5a0] sm:$0xf0] }
  0xe5   :  { %1866 = vmatpush.bf16.msrb.mxu3 %v2940_v56  ;;  %1829 = vmatpush.bf16.msrb.mxu0 %v2212_v59  ;;  %v3037_v56 = vld [vmem:[%s4793_s3 + $0x164] sm:$0xf]  ;;  %v2269_v59 = vld [vmem:[%s4793_s3 + $0x17c] sm:$0xf0] }
  0xe6   :  { %1842 = vmatpush.bf16.msrb.mxu1 %v2436_v62  ;;  %v2800_v62 = vor.u32 %v3173_v53, %v2799_v52  ;;  %v2272_v7 = vor.u32 %v3037_v56, %v2269_v59  ;;  %v2157_v52 = vld [vmem:[%s4793_s3 + $0x9c] sm:$0xf0]  ;;  %v2664_v53 = vor.u32 %v3135_v45, %v2661_v46  ;;  %v2888_v56 = vor.u32 %v3191_v48, %v2885_v49 }
  0xe7   :  { %v2975_v46 = vld [vmem:[%s4793_s3 + $0x6e0] sm:$0xf]  ;;  %v2500_v48 = vor.u32 %v3097_v37, %v2499_v36  ;;  %v3069_v36 = vld [vmem:[%s4793_s3 + $0x260] sm:$0xf0] }
  0xe8   :  { %1854 = vmatpush.bf16.msrb.mxu2 %v2688_v2  ;;  %v2771_v2 = vld [vmem:[%s4793_s3 + $0x550] sm:$0xf] }
  0xe9   :  { %1867 = vmatpush.bf16.msrb.mxu3 %v2912_v5  ;;  %1830 = vmatpush.bf16.msrb.mxu0 %v2184_v9  ;;  %v2745_v5 = vld [vmem:[%s4793_s3 + $0x534] sm:$0xf0]  ;;  %v2772_v14 = vor.u32 %v3166_v3, %v2771_v2  ;;  %v3058_v3 = vld [vmem:[%s4793_s3 + $0x20c] sm:$0xf] }
  0xea   :  { %1843 = vmatpush.bf16.msrb.mxu1 %v2408_v12  ;;  %v2969_v9 = vld [vmem:[%s4793_s3 + $0x6f4] sm:$0xf0]  ;;  %v3030_v12 = vld [vmem:[%s4793_s3 + $0x12c] sm:$0xf] }
  0xec   :  { %1855 = vmatpush.bf16.msrb.mxu2 %v2660_v15  ;;  %v2748_v15 = vor.u32 %v3156_v4, %v2745_v5  ;;  %v2353_v4 = vld [vmem:[%s4793_s3 + $0x224] sm:$0xf0]  ;;  %v2860_v5 = vor.u32 %v3184_v60, %v2857_v61  ;;  %v3209_v61 = vld [vmem:[%s4793_s3 + $0x6c0] sm:$0xf0] }
  0xed   :  { %1868 = vmatpush.bf16.msrb.mxu3 %v2884_v18  ;;  %1831 = vmatpush.bf16.msrb.mxu0 %v2156_v21  ;;  %v2972_v18 = vor.u32 %v3212_v8, %v2969_v9  ;;  %v2244_v21 = vor.u32 %v3030_v12, %v2241_v13  ;;  %v2605_v8 = vld [vmem:[%s4793_s3 + $0x41c] sm:$0xf0]  ;;  %v2132_v9 = vor.u32 %v3002_v63, %v2129_v0  ;;  %v2995_v12 = vld [vmem:[%s4793_s3 + $0x14] sm:$0xf]  ;;  %v2947_v60 = vld [vmem:[%s4793_s3 + $0x6a8] sm:$0xf] }
  0xee   :  { %1844 = vmatpush.bf16.msrb.mxu1 %v2380_v24  ;;  %v2468_v24 = vor.u32 %v3086_v16, %v2465_v17  ;;  %v2356_v13 = vor.u32 %v3058_v3, %v2353_v4  ;;  %v2325_v16 = vld [vmem:[%s4793_s3 + $0x1ec] sm:$0xf0]  ;;  %v2219_v63 = vld [vmem:[%s4793_s3 + $0xf8] sm:$0xf]  ;;  %v3027_v0 = vld [vmem:[%s4793_s3 + $0x110] sm:$0xf0] }
  0xef   :  { %v2443_v4 = vld [vmem:[%s4793_s3 + $0x2b8] sm:$0xf] }
  0xf0   :  { %1856 = vmatpush.bf16.msrb.mxu2 %v2632_v27  ;;  %v2720_v27 = vor.u32 %v3149_v19, %v2717_v20  ;;  %v3048_v19 = vld [vmem:[%s4793_s3 + $0x1b8] sm:$0xf0]  ;;  %v2527_v20 = vld [vmem:[%s4793_s3 + $0x360] sm:$0xf] }
  0xf1   :  { %1869 = vmatpush.bf16.msrb.mxu3 %v2856_v31  ;;  %1832 = vmatpush.bf16.msrb.mxu0 %v2128_v35  ;;  %v2944_v31 = vor.u32 %v3205_v22, %v2941_v23  ;;  %v2216_v35 = vor.u32 %v3023_v25, %v2213_v26  ;;  %v3104_v22 = vld [vmem:[%s4793_s3 + $0x378] sm:$0xf0]  ;;  %v3114_v23 = vld [vmem:[%s4793_s3 + $0x3cc] sm:$0xf] }
  0xf2   :  { %1845 = vmatpush.bf16.msrb.mxu1 %v2352_v39  ;;  %v3016_v39 = vld [vmem:[%s4793_s3 + $0xbc] sm:$0xf]  ;;  %v3170_v26 = vld [vmem:[%s4793_s3 + $0x58c] sm:$0xf]  ;;  %v2528_v32 = vor.u32 %v3104_v22, %v2527_v20  ;;  %v2415_v20 = vld [vmem:[%s4793_s3 + $0x280] sm:$0xf] }
  0xf4   :  { %1857 = vmatpush.bf16.msrb.mxu2 %v2604_v43  ;;  %v2409_v43 = vld [vmem:[%s4793_s3 + $0x294] sm:$0xf0] }
  0xf5   :  { %1870 = vmatpush.bf16.msrb.mxu3 %v2828_v47  ;;  %1833 = vmatpush.bf16.msrb.mxu0 %v2100_v51  ;;  %v2188_v47 = vor.u32 %v3016_v39, %v2185_v40  ;;  %v2412_v50 = vor.u32 %v3072_v42, %v2409_v43  ;;  %v3009_v51 = vld [vmem:[%s4793_s3 + $0x84] sm:$0xf]  ;;  %v3107_v39 = vld [vmem:[%s4793_s3 + $0x394] sm:$0xf]  ;;  %v2549_v40 = vld [vmem:[%s4793_s3 + $0x3ac] sm:$0xf0] }
  0xf6   :  { %1846 = vmatpush.bf16.msrb.mxu1 %v2324_v54  ;;  %v3065_v54 = vld [vmem:[%s4793_s3 + $0x244] sm:$0xf]  ;;  %v2160_v59 = vor.u32 %v3009_v51, %v2157_v52  ;;  %v2773_v42 = vld [vmem:[%s4793_s3 + $0x56c] sm:$0xf0]  ;;  %v2751_v43 = vld [vmem:[%s4793_s3 + $0x520] sm:$0xf]  ;;  %v2552_v49 = vor.u32 %v3107_v39, %v2549_v40 }
  0xf7   :  { %v3034_v51 = vld [vmem:[%s4793_s3 + $0x148] sm:$0xf0]  ;;  %v2639_v39 = vld [vmem:[%s4793_s3 + $0x440] sm:$0xf]  ;;  %v3132_v40 = vld [vmem:[%s4793_s3 + $0x458] sm:$0xf0] }
  0xf8   :  { %1858 = vmatpush.bf16.msrb.mxu2 %v2576_v58  ;;  %1834 = vmatmul.bf16.vlgmr.msrb.gmra.mxu0 %v3791_v1  ;;  %v2633_v58 = vld [vmem:[%s4793_s3 + $0x454] sm:$0xf0] }
  0xf9   :  { %1878 = vmatpush.bf16.msra.mxu0 %v2300_v55  ;;  %1871 = vmatpush.bf16.msrb.mxu3 %v2800_v62  ;;  %v2381_v55 = vld [vmem:[%s4793_s3 + $0x25c] sm:$0xf0] }
  0xfa   :  { %1891 = vmatpush.bf16.msra.mxu1 %v2524_v57  ;;  %v3128_v57 = vld [vmem:[%s4793_s3 + $0x43c] sm:$0xf]  ;;  %v2384_v62 = vor.u32 %v3065_v54, %v2381_v55  ;;  %v2471_v54 = vld [vmem:[%s4793_s3 + $0x2f0] sm:$0xf]  ;;  %v3090_v55 = vld [vmem:[%s4793_s3 + $0x308] sm:$0xf0] }
  0xfb   :  { %1847 = vmatmul.bf16.vlgmr.msrb.gmra.mxu1 %v3799_v6  ;;  %v2636_v2 = vor.u32 %v3128_v57, %v2633_v58  ;;  %v2723_v57 = vld [vmem:[%s4793_s3 + $0x4e8] sm:$0xf]  ;;  %v3153_v58 = vld [vmem:[%s4793_s3 + $0x500] sm:$0xf0] }
  0xfc   :  { %1859 = vmatpush.bf16.msrb.mxu2 %v2548_v11  ;;  %v2829_v11 = vld [vmem:[%s4793_s3 + $0x5dc] sm:$0xf0]  ;;  %v2724_v3 = vor.u32 %v3153_v58, %v2723_v57  ;;  %v2835_v57 = vld [vmem:[%s4793_s3 + $0x5c8] sm:$0xf]  ;;  %v3181_v58 = vld [vmem:[%s4793_s3 + $0x5e0] sm:$0xf0] }
  0xfd   :  { %1879 = vmatpush.bf16.msra.mxu0 %v2272_v7  ;;  %1872 = vmatpush.bf16.msrb.mxu3 %v2772_v14  ;;  %v3121_v7 = vld [vmem:[%s4793_s3 + $0x404] sm:$0xf]  ;;  %v2101_v14 = vld [vmem:[%s4793_s3 + $0x2c] sm:$0xf0] }
  0xfe   :  { %1892 = vmatpush.bf16.msra.mxu1 %v2496_v10  ;;  %v3177_v10 = vld [vmem:[%s4793_s3 + $0x5c4] sm:$0xf]  ;;  %v2608_v17 = vor.u32 %v3121_v7, %v2605_v8  ;;  %v2104_v25 = vor.u32 %v2995_v12, %v2101_v14  ;;  %v2948_v8 = vor.u32 %v3209_v61, %v2947_v60  ;;  %v2220_v12 = vor.u32 %v3027_v0, %v2219_v63  ;;  %v3202_v14 = vld [vmem:[%s4793_s3 + $0x688] sm:$0xf0]  ;;  %v2999_v63 = vld [vmem:[%s4793_s3 + $0x30] sm:$0xf0] }
  0xff   :  { %1860 = vmatmul.bf16.vlgmr.msrb.gmra.mxu2 %v3833_v28 }
 0x100   :  { %1904 = vmatpush.bf16.msra.mxu2 %v2748_v15  ;;  %1873 = vmatmul.bf16.vlgmr.msrb.gmra.mxu3 %v3844_v34  ;;  %v3051_v15 = vld [vmem:[%s4793_s3 + $0x1d4] sm:$0xf] }
 0x101   :  { %1917 = vmatpush.bf16.msra.mxu3 %v2972_v18  ;;  %1880 = vmatpush.bf16.msra.mxu0 %v2244_v21  ;;  %v2303_v18 = vld [vmem:[%s4793_s3 + $0x1a0] sm:$0xf]  ;;  %v2832_v21 = vor.u32 %v3177_v10, %v2829_v11  ;;  %v2328_v29 = vor.u32 %v3051_v15, %v2325_v16  ;;  %v3146_v10 = vld [vmem:[%s4793_s3 + $0x4c8] sm:$0xf0] }
 0x102   :  { %1893 = vmatpush.bf16.msra.mxu1 %v2468_v24  ;;  %v2577_v24 = vld [vmem:[%s4793_s3 + $0x3e4] sm:$0xf0]  ;;  %v2304_v30 = vor.u32 %v3048_v19, %v2303_v18  ;;  %v3020_v18 = vld [vmem:[%s4793_s3 + $0xd8] sm:$0xf0] }
 0x103   :  { %v2580_v33 = vor.u32 %v3114_v23, %v2577_v24  ;;  %v2667_v23 = vld [vmem:[%s4793_s3 + $0x478] sm:$0xf]  ;;  %v3139_v24 = vld [vmem:[%s4793_s3 + $0x490] sm:$0xf0] }
 0x104   :  { %1905 = vmatpush.bf16.msra.mxu2 %v2720_v27  ;;  %v2801_v27 = vld [vmem:[%s4793_s3 + $0x5a4] sm:$0xf0] }
 0x105   :  { %1918 = vmatpush.bf16.msra.mxu3 %v2944_v31  ;;  %1881 = vmatpush.bf16.msra.mxu0 %v2216_v35  ;;  %v2275_v31 = vld [vmem:[%s4793_s3 + $0x168] sm:$0xf]  ;;  %v3041_v35 = vld [vmem:[%s4793_s3 + $0x180] sm:$0xf0] }
 0x106   :  { %1894 = vmatpush.bf16.msra.mxu1 %v2440_v38  ;;  %v2804_v38 = vor.u32 %v3170_v26, %v2801_v27  ;;  %v2276_v45 = vor.u32 %v3041_v35, %v2275_v31  ;;  %v2891_v26 = vld [vmem:[%s4793_s3 + $0x638] sm:$0xf]  ;;  %v3195_v27 = vld [vmem:[%s4793_s3 + $0x650] sm:$0xf0]  ;;  %v2163_v31 = vld [vmem:[%s4793_s3 + $0x88] sm:$0xf] }
 0x107   :  { %v2387_v35 = vld [vmem:[%s4793_s3 + $0x248] sm:$0xf] }
 0x108   :  { %1906 = vmatpush.bf16.msra.mxu2 %v2692_v41  ;;  %v3163_v41 = vld [vmem:[%s4793_s3 + $0x554] sm:$0xf] }
 0x109   :  { %1919 = vmatpush.bf16.msra.mxu3 %v2916_v44  ;;  %1882 = vmatpush.bf16.msra.mxu0 %v2188_v47  ;;  %v3160_v44 = vld [vmem:[%s4793_s3 + $0x538] sm:$0xf0]  ;;  %v2776_v52 = vor.u32 %v3163_v41, %v2773_v42 }
 0x10a   :  { %1895 = vmatpush.bf16.msra.mxu1 %v2412_v50  ;;  %v3216_v47 = vld [vmem:[%s4793_s3 + $0x6f8] sm:$0xf0]  ;;  %v2247_v50 = vld [vmem:[%s4793_s3 + $0x130] sm:$0xf] }
 0x10c   :  { %1907 = vmatpush.bf16.msra.mxu2 %v2664_v53  ;;  %v2752_v53 = vor.u32 %v3160_v44, %v2751_v43  ;;  %v2863_v43 = vld [vmem:[%s4793_s3 + $0x600] sm:$0xf]  ;;  %v3188_v44 = vld [vmem:[%s4793_s3 + $0x618] sm:$0xf0] }
 0x10d   :  { %1920 = vmatpush.bf16.msra.mxu3 %v2888_v56  ;;  %1883 = vmatpush.bf16.msra.mxu0 %v2160_v59  ;;  %v2976_v56 = vor.u32 %v3216_v47, %v2975_v46  ;;  %v2248_v59 = vor.u32 %v3034_v51, %v2247_v50  ;;  %v2388_v46 = vor.u32 %v3069_v36, %v2387_v35  ;;  %v2135_v47 = vld [vmem:[%s4793_s3 + $0x50] sm:$0xf]  ;;  %v3062_v51 = vld [vmem:[%s4793_s3 + $0x228] sm:$0xf0] }
 0x10e   :  { %1896 = vmatpush.bf16.msra.mxu1 %v2384_v62  ;;  %v2472_v62 = vor.u32 %v3090_v55, %v2471_v54  ;;  %v2359_v50 = vld [vmem:[%s4793_s3 + $0x210] sm:$0xf]  ;;  %v3125_v54 = vld [vmem:[%s4793_s3 + $0x420] sm:$0xf0] }
 0x10f   :  { %v2360_v61 = vor.u32 %v3062_v51, %v2359_v50 }
 0x110   :  { %1908 = vmatpush.bf16.msra.mxu2 %v2636_v2  ;;  %v4646_v2 = vld [vmem:[%s4794_s4] sm:$0x7f] }
 0x111   :  { %1921 = vmatpush.bf16.msra.mxu3 %v2860_v5  ;;  %1884 = vmatpush.bf16.msra.mxu0 %v2132_v9  ;;  %v3083_v5 = vld [vmem:[%s4793_s3 + $0x2d0] sm:$0xf0]  ;;  %v2695_v9 = vld [vmem:[%s4793_s3 + $0x4b0] sm:$0xf]  ;;  %v452_v15 = vperm.slane %v4646_v2, 0 }
 0x112   :  { %1897 = vmatpush.bf16.msra.mxu1 %v2356_v13  ;;  %v2919_v13 = vld [vmem:[%s4793_s3 + $0x670] sm:$0xf]  ;;  %v2444_v16 = vor.u32 %v3083_v5, %v2443_v4  ;;  %v2696_v19 = vor.u32 %v3146_v10, %v2695_v9  ;;  %v3055_v4 = vld [vmem:[%s4793_s3 + $0x1f0] sm:$0xf0]  ;;  %v3118_v10 = vld [vmem:[%s4793_s3 + $0x3e8] sm:$0xf0] }
 0x113   :  { %v2920_v22 = vor.u32 %v3202_v14, %v2919_v13  ;;  %v2583_v9 = vld [vmem:[%s4793_s3 + $0x3d0] sm:$0xf]  ;;  %v3174_v14 = vld [vmem:[%s4793_s3 + $0x5a8] sm:$0xf0] }
 0x114   :  { %1909 = vmatpush.bf16.msra.mxu2 %v2608_v17  ;;  %v1627_v7 = vpop.f32.mrf.mxu0  ;;  %v2191_v17 = vld [vmem:[%s4793_s3 + $0xc0] sm:$0xf]  ;;  %v2807_v13 = vld [vmem:[%s4793_s3 + $0x590] sm:$0xf] }
 0x115   :  { %1922 = vmatpush.bf16.msra.mxu3 %v2832_v21  ;;  %1885 = vmatpush.bf16.msra.mxu0 %v2104_v25  ;;  %v1640_v11 = vpop.f32.mrf.mxu1  ;;  %v3076_v21 = vld [vmem:[%s4793_s3 + $0x298] sm:$0xf0]  ;;  %v2192_v25 = vor.u32 %v3020_v18, %v2191_v17  ;;  %v453_v17 = vperm.slane %v4646_v2, 1  ;;  %v2808_v18 = vor.u32 %v3174_v14, %v2807_v13 }
 0x116   :  { %1898 = vmatpush.bf16.msra.mxu1 %v2328_v29  ;;  %v1628_v29 = vadd.f32 %v1627_v7, %v452_v15 }
 0x118   :  { %1910 = vmatpush.bf16.msra.mxu2 %v2580_v33  ;;  %1886 = vmatmul.bf16.vlgmr.msra.gmra.mxu0 %v3791_v1  ;;  %v2668_v33 = vor.u32 %v3139_v24, %v2667_v23  ;;  %v3167_v23 = vld [vmem:[%s4793_s3 + $0x570] sm:$0xf0] }
 0x119   :  { %1930 = vmatpush.bf16.msrb.mxu0 %v2304_v30  ;;  %1923 = vmatpush.bf16.msra.mxu3 %v2804_v38  ;;  %v2416_v30 = vor.u32 %v3076_v21, %v2415_v20  ;;  %v2892_v38 = vor.u32 %v3195_v27, %v2891_v26  ;;  %v3111_v20 = vld [vmem:[%s4793_s3 + $0x3b0] sm:$0xf0] }
 0x11a   :  { %1943 = vmatpush.bf16.msrb.mxu1 %v2528_v32  ;;  %v3013_v32 = vld [vmem:[%s4793_s3 + $0xa0] sm:$0xf0] }
 0x11b   :  { %1899 = vmatmul.bf16.vlgmr.msra.gmra.mxu1 %v3799_v6  ;;  %v2164_v42 = vor.u32 %v3013_v32, %v2163_v31 }
 0x11c   :  { %1911 = vmatpush.bf16.msra.mxu2 %v2552_v49  ;;  %v1629_v37 = vpop.f32.mrf.mxu0  ;;  %v2640_v49 = vor.u32 %v3132_v40, %v2639_v39  ;;  %v454_v39 = vperm.slane %v4646_v2, 2 }
 0x11d   :  { %1931 = vmatpush.bf16.msrb.mxu0 %v2276_v45  ;;  %1924 = vmatpush.bf16.msra.mxu3 %v2776_v52  ;;  %v1642_v41 = vpop.f32.mrf.mxu1  ;;  %v1641_v45 = vadd.f32 %v1640_v11, %v1628_v29  ;;  %v2864_v52 = vor.u32 %v3188_v44, %v2863_v43 }
 0x11e   :  { %1944 = vmatpush.bf16.msrb.mxu1 %v2500_v48  ;;  %v3006_v48 = vld [vmem:[%s4793_s3 + $0x68] sm:$0xf0] }
 0x11f   :  { %1912 = vmatmul.bf16.vlgmr.msra.gmra.mxu2 %v3833_v28 }
 0x120   :  { %1956 = vmatpush.bf16.msrb.mxu2 %v2752_v53  ;;  %1925 = vmatmul.bf16.vlgmr.msra.gmra.mxu3 %v3844_v34  ;;  %v2611_v53 = vld [vmem:[%s4793_s3 + $0x408] sm:$0xf] }
 0x121   :  { %1969 = vmatpush.bf16.msrb.mxu3 %v2976_v56  ;;  %1932 = vmatpush.bf16.msrb.mxu0 %v2248_v59  ;;  %v2136_v56 = vor.u32 %v3006_v48, %v2135_v47  ;;  %v2612_v0 = vor.u32 %v3125_v54, %v2611_v53  ;;  %v455_v53 = vperm.slane %v4646_v2, 3 }
 0x122   :  { %1945 = vmatpush.bf16.msrb.mxu1 %v2472_v62  ;;  %v1653_v55 = vpop.f32.mrf.mxu2  ;;  %v2107_v62 = vld [vmem:[%s4793_s3 + $0x18] sm:$0xf] }
 0x123   :  { %v1654_v59 = vadd.f32 %v1653_v55, %v1641_v45  ;;  %v1666_v60 = vpop.f32.mrf.mxu3 }
 0x124   :  { %1957 = vmatpush.bf16.msrb.mxu2 %v2724_v3  ;;  %v2331_v3 = vld [vmem:[%s4793_s3 + $0x1d8] sm:$0xf]  ;;  %v1679_v7 = vpop.f32.mrf.mxu0 }
 0x125   :  { %1970 = vmatpush.bf16.msrb.mxu3 %v2948_v8  ;;  %1933 = vmatpush.bf16.msrb.mxu0 %v2220_v12  ;;  %v1667_v5 = vadd.f32 %v1666_v60, %v1654_v59  ;;  %v2836_v8 = vor.u32 %v3181_v58, %v2835_v57  ;;  %v1692_v11 = vpop.f32.mrf.mxu1  ;;  %v2108_v12 = vor.u32 %v2999_v63, %v2107_v62 }
 0x126   :  { %1946 = vmatpush.bf16.msrb.mxu1 %v2444_v16  ;;  %v2332_v15 = vor.u32 %v3055_v4, %v2331_v3  ;;  %v2584_v16 = vor.u32 %v3118_v10, %v2583_v9  ;;  %v1680_v27 = vadd.f32 %v1679_v7, %v453_v17 }
 0x127   :  { %3218 = vtanh.f32 %v1667_v5  ;;  %v456_v5 = vperm.slane %v4646_v2, 4 }
 0x128   :  { %1958 = vmatpush.bf16.msrb.mxu2 %v2696_v19  ;;  %v2555_v19 = vld [vmem:[%s4793_s3 + $0x398] sm:$0xf]  ;;  %v1693_v32 = vadd.f32 %v1692_v11, %v1680_v27 }
 0x129   :  { %1971 = vmatpush.bf16.msrb.mxu3 %v2920_v22  ;;  %1934 = vmatpush.bf16.msrb.mxu0 %v2192_v25  ;;  %v2779_v22 = vld [vmem:[%s4793_s3 + $0x558] sm:$0xf]  ;;  %v2556_v25 = vor.u32 %v3111_v20, %v2555_v19  ;;  %v457_v20 = vperm.slane %v4646_v2, 5  ;;  %s3258_s3 = smov [#allocation2]  }
 0x12a   :  { %1947 = vmatpush.bf16.msrb.mxu1 %v2416_v30  ;;  %v1655_v21 = vpop.f32.mrf.mxu2  ;;  %v2780_v30 = vor.u32 %v3167_v23, %v2779_v22  ;;  %s2002_s17 = sshll.u32 %s3258_s3, 4  ;;  %s2003_s17 = int_to_ptr.vmem [resolvable:$true] %s2002_s17 }
 0x12b   :  { %v1668_v24 = vpop.f32.mrf.mxu3 }
 0x12c   :  { %1959 = vmatpush.bf16.msrb.mxu2 %v2668_v33  ;;  %v1681_v29 = vpop.f32.mrf.mxu0 }
 0x12d   :  { %1972 = vmatpush.bf16.msrb.mxu3 %v2892_v38  ;;  %1935 = vmatpush.bf16.msrb.mxu0 %v2164_v42  ;;  %v3219_v26 = vpop.eup %3218  ;;  %v1694_v31 = vpop.f32.mrf.mxu1 }
 0x12e   :  { %1948 = vmatpush.bf16.msrb.mxu1 %v2388_v46  ;;  %1989 = vst [vmem:[#allocation2] sm:$0xff] %v3219_v26 }
 0x130   :  { %1960 = vmatpush.bf16.msrb.mxu2 %v2640_v49 }
 0x131   :  { %1973 = vmatpush.bf16.msrb.mxu3 %v2864_v52  ;;  %1936 = vmatpush.bf16.msrb.mxu0 %v2136_v56 }
 0x132   :  { %1949 = vmatpush.bf16.msrb.mxu1 %v2360_v61  ;;  %v1705_v33 = vpop.f32.mrf.mxu2 }
 0x133   :  { %v1706_v35 = vadd.f32 %v1705_v33, %v1693_v32  ;;  %v1718_v36 = vpop.f32.mrf.mxu3 }
 0x134   :  { %1961 = vmatpush.bf16.msrb.mxu2 %v2612_v0 }
 0x135   :  { %1974 = vmatpush.bf16.msrb.mxu3 %v2836_v8  ;;  %1937 = vmatpush.bf16.msrb.mxu0 %v2108_v12  ;;  %v1719_v37 = vadd.f32 %v1718_v36, %v1706_v35  ;;  %v1731_v38 = vpop.f32.mrf.mxu0  ;;  %v458_v36 = vperm.slane %v4646_v2, 6 }
 0x136   :  { %1950 = vmatpush.bf16.msrb.mxu1 %v2332_v15  ;;  %v1732_v42 = vadd.f32 %v1731_v38, %v454_v39 }
 0x137   :  { %3220 = vtanh.f32 %v1719_v37 }
 0x138   :  { %1962 = vmatpush.bf16.msrb.mxu2 %v2584_v16  ;;  %1938 = vmatmul.bf16.vlgmr.msrb.gmra.mxu0 %v3791_v1  ;;  %v1744_v1 = vpop.f32.mrf.mxu1 }
 0x139   :  { %1975 = vmatpush.bf16.msrb.mxu3 %v2808_v18  ;;  %1951 = vmatmul.bf16.vlgmr.msrb.gmra.mxu1 %v3799_v6  ;;  %v1745_v45 = vadd.f32 %v1744_v1, %v1732_v42 }
 0x13a   :  { %v1707_v40 = vpop.f32.mrf.mxu2 }
 0x13b   :  { %v1720_v41 = vpop.f32.mrf.mxu3 }
 0x13c   :  { %1963 = vmatpush.bf16.msrb.mxu2 %v2556_v25 }
 0x13d   :  { %1976 = vmatpush.bf16.msrb.mxu3 %v2780_v30  ;;  %v3221_v6 = vpop.eup %3220  ;;  %v1733_v43 = vpop.f32.mrf.mxu0 }
 0x13e   :  { %1990 = vst [vmem:[#allocation2 + $0x8] sm:$0xff] %v3221_v6 }
 0x13f   :  { %1964 = vmatmul.bf16.vlgmr.msrb.gmra.mxu2 %v3833_v28 }
 0x140   :  { %1977 = vmatmul.bf16.vlgmr.msrb.gmra.mxu3 %v3844_v34  ;;  %v1746_v44 = vpop.f32.mrf.mxu1 }
 0x142   :  { %v1757_v46 = vpop.f32.mrf.mxu2 }
 0x143   :  { %v1770_v47 = vpop.f32.mrf.mxu3  ;;  %v1758_v48 = vadd.f32 %v1757_v46, %v1745_v45 }
 0x145   :  { %v1771_v28 = vadd.f32 %v1770_v47, %v1758_v48 }
 0x147   :  { %3222 = vtanh.f32 %v1771_v28 }
 0x14a   :  { %v1759_v34 = vpop.f32.mrf.mxu2 }
 0x14b   :  { %v1772_v49 = vpop.f32.mrf.mxu3 }
 0x14d   :  { %v3223_v50 = vpop.eup %3222 }
 0x14e   :  { %1991 = vst [vmem:[#allocation2 + $0x10] sm:$0xff] %v3223_v50 }
 0x155   :  { %v1783_v51 = vpop.f32.mrf.mxu0 }
 0x156   :  { %v1784_v54 = vadd.f32 %v1783_v51, %v455_v53 }
 0x158   :  { %v1796_v52 = vpop.f32.mrf.mxu1 }
 0x159   :  { %v1797_v57 = vadd.f32 %v1796_v52, %v1784_v54 }
 0x15d   :  { %v1785_v55 = vpop.f32.mrf.mxu0 }
 0x160   :  { %v1798_v56 = vpop.f32.mrf.mxu1 }
 0x162   :  { %v1809_v58 = vpop.f32.mrf.mxu2 }
 0x163   :  { %v1810_v59 = vadd.f32 %v1809_v58, %v1797_v57  ;;  %v1822_v60 = vpop.f32.mrf.mxu3 }
 0x165   :  { %v1823_v61 = vadd.f32 %v1822_v60, %v1810_v59 }
 0x167   :  { %3224 = vtanh.f32 %v1823_v61 }
 0x16a   :  { %v1811_v62 = vpop.f32.mrf.mxu2 }
 0x16b   :  { %v1824_v63 = vpop.f32.mrf.mxu3 }
 0x16d   :  { %v3225_v0 = vpop.eup %3224 }
 0x16e   :  { %1992 = vst [vmem:[#allocation2 + $0x18] sm:$0xff] %v3225_v0 }
 0x175   :  { %v1835_v3 = vpop.f32.mrf.mxu0 }
 0x176   :  { %v1836_v7 = vadd.f32 %v1835_v3, %v456_v5 }
 0x178   :  { %v1848_v4 = vpop.f32.mrf.mxu1 }
 0x179   :  { %v1849_v10 = vadd.f32 %v1848_v4, %v1836_v7 }
 0x17d   :  { %v1837_v8 = vpop.f32.mrf.mxu0 }
 0x180   :  { %v1850_v9 = vpop.f32.mrf.mxu1 }
 0x182   :  { %v1861_v11 = vpop.f32.mrf.mxu2 }
 0x183   :  { %v1862_v12 = vadd.f32 %v1861_v11, %v1849_v10  ;;  %v1874_v13 = vpop.f32.mrf.mxu3 }
 0x185   :  { %v1875_v14 = vadd.f32 %v1874_v13, %v1862_v12 }
 0x187   :  { %3226 = vtanh.f32 %v1875_v14 }
 0x18a   :  { %v1863_v15 = vpop.f32.mrf.mxu2 }
 0x18b   :  { %v1876_v16 = vpop.f32.mrf.mxu3 }
 0x18d   :  { %v3227_v17 = vpop.eup %3226 }
 0x18e   :  { %1993 = vst [vmem:[#allocation2 + $0x20] sm:$0xff] %v3227_v17 }
 0x195   :  { %v1887_v18 = vpop.f32.mrf.mxu0 }
 0x196   :  { %v1888_v21 = vadd.f32 %v1887_v18, %v457_v20 }
 0x198   :  { %v1900_v19 = vpop.f32.mrf.mxu1 }
 0x199   :  { %v1901_v24 = vadd.f32 %v1900_v19, %v1888_v21 }
 0x19d   :  { %v1889_v22 = vpop.f32.mrf.mxu0 }
 0x1a0   :  { %v1902_v23 = vpop.f32.mrf.mxu1 }
 0x1a2   :  { %v1913_v25 = vpop.f32.mrf.mxu2 }
 0x1a3   :  { %v1914_v26 = vadd.f32 %v1913_v25, %v1901_v24  ;;  %v1926_v27 = vpop.f32.mrf.mxu3 }
 0x1a5   :  { %v1927_v29 = vadd.f32 %v1926_v27, %v1914_v26 }
 0x1a7   :  { %3228 = vtanh.f32 %v1927_v29 }
 0x1aa   :  { %v1915_v30 = vpop.f32.mrf.mxu2 }
 0x1ab   :  { %v1928_v31 = vpop.f32.mrf.mxu3 }
 0x1ad   :  { %v3229_v32 = vpop.eup %3228 }
 0x1ae   :  { %1994 = vst [vmem:[#allocation2 + $0x28] sm:$0xff] %v3229_v32 }
 0x1b5   :  { %v1939_v33 = vpop.f32.mrf.mxu0 }
 0x1b6   :  { %v1952_v35 = vpop.f32.mrf.mxu1  ;;  %v1940_v37 = vadd.f32 %v1939_v33, %v458_v36 }
 0x1b8   :  { %v1953_v39 = vadd.f32 %v1952_v35, %v1940_v37 }
 0x1bd   :  { %v1941_v38 = vpop.f32.mrf.mxu0 }
 0x1be   :  { %v1954_v1 = vpop.f32.mrf.mxu1 }
 0x1c2   :  { %v1965_v40 = vpop.f32.mrf.mxu2 }
 0x1c3   :  { %v1966_v41 = vadd.f32 %v1965_v40, %v1953_v39  ;;  %v1978_v6 = vpop.f32.mrf.mxu3 }
 0x1c5   :  { %v1979_v42 = vadd.f32 %v1978_v6, %v1966_v41 }
 0x1c7   :  { %3230 = vtanh.f32 %v1979_v42 }
 0x1ca   :  { %v1967_v43 = vpop.f32.mrf.mxu2 }
 0x1cb   :  { %v1980_v44 = vpop.f32.mrf.mxu3 }
 0x1cd   :  { %v3231_v2 = vpop.eup %3230 }
 0x1ce   :  { %1996 = vst.msk [vmem:[#allocation2 + $0x30] sm:$0xff] %vm1995_vm1, %v3231_v2 }
 0x1cf   :  { %2007 = dma.vmem_to_hbm [thread:$0]  %s2003_s17, 896, %s2005_s20, [#allocation3]  }
 0x1d0   :  { %3256 = dma.done.wait [#allocation3], 896  }
 0x1d1   :  { %3257 = vsyncadd [#allocation3], 4294966400 }
 0x1d2   :  { %2012 = vsyncpa [#allocation3], 1 }

</bundles_post_ra>
